<compile_context>
chip_gen: v7x
topology: tpu7x:2x2x1
jax: 0.10.0
libtpu: 0.0.40
codegen_flags: <defaults>
</compile_context>

<pallas_src>
import math
import functools

import jax
import jax.numpy as jnp
from jax.experimental import pallas as pl
from jax.experimental.pallas import tpu as pltpu


_MASK_VALUE = -1e30
_MIB = 1024 * 1024


# ----------------------------------------------------------------------------
# Helpers
# ----------------------------------------------------------------------------

def _layernorm(v, w, b, eps):
    v = v.astype(jnp.float32)
    mu = jnp.mean(v, axis=-1, keepdims=True)
    var = jnp.mean((v - mu) ** 2, axis=-1, keepdims=True)
    return (v - mu) * jax.lax.rsqrt(var + eps) * w.astype(jnp.float32) + b.astype(jnp.float32)


def _largest_divisor_leq(n, cap):
    cap = max(1, min(n, cap))
    for d in range(cap, 0, -1):
        if n % d == 0:
            return d
    return 1


def _pick_bt(B, S):
    # Target ~512 rows per grid step: keeps MLP weight reuse per DMA high
    # (arithmetic intensity above the bf16 roofline knee) while the per-head
    # score tensors stay bt*S^2 (per-sequence attention).
    return _largest_divisor_leq(B, max(1, 512 // max(S, 1)))


def _pick_ti(I, D, vmem_cap):
    # Tile the MLP intermediate dim so the double-buffered bf16 fc1/fc2 tiles
    # use roughly <= 1/4 of VMEM.  On 128 MiB parts this usually gives ti = I
    # (ni = 1); on v7x (64 MiB) it tiles to a 128-multiple divisor.
    budget = vmem_cap // 4
    cap = max(128, budget // (2 * D * 2 * 2))  # 2 tensors * bf16 * 2 buffers
    if I <= cap:
        return I
    for d in range(min(cap, I), 127, -1):
        if I % d == 0 and d % 128 == 0:
            return d
    return I


def _tpu_vmem_capacity():
    try:
        info = pltpu.get_tpu_info()
        cap = getattr(info, "vmem_capacity_bytes", None)
        if cap:
            return int(cap)
    except Exception:
        pass
    return 64 * _MIB  # conservative (v7x-sized) fallback


def _vmem_limit(vmem_cap):
    if vmem_cap >= 100 * _MIB:          # v5e / v6e: 128 MiB physical
        return 96 * _MIB
    return min(56 * _MIB, max(32 * _MIB, vmem_cap - 8 * _MIB))  # v7x: 64 MiB


# ----------------------------------------------------------------------------
# Pallas kernels
# ----------------------------------------------------------------------------

def clip_layer_kernel(x_ref,
                      ln1_w_ref, ln1_b_ref,
                      wq_ref, bq_ref, wk_ref, bk_ref, wv_ref, bv_ref,
                      wo_ref, bo_ref,
                      ln2_w_ref, ln2_b_ref,
                      w1_ref, b1_ref, w2_ref, b2_ref,
                      fln_w_ref, fln_b_ref,
                      out_ref,
                      h2_ref, acc_ref,
                      *, heads, eps, act, apply_final_ln):
    """One fused CLIP encoder layer.  grid = (batch_tiles, I_tiles)."""
    bt, seq, dim = x_ref.shape
    n = bt * seq
    dh = dim // heads
    cdt = wq_ref.dtype                      # matmul compute dtype (bf16)
    i = pl.program_id(1)
    n_i = pl.num_programs(1)

    # -------- i == 0: attention branch + LN2, cached in VMEM scratch --------
    @pl.when(i == 0)
    def _attention():
        x = x_ref[...].astype(jnp.float32).reshape(n, dim)
        h = _layernorm(x, ln1_w_ref[...], ln1_b_ref[...], eps).astype(cdt)

        def proj(w_ref, b_ref):
            return (jnp.dot(h, w_ref[...], preferred_element_type=jnp.float32)
                    + b_ref[...].astype(jnp.float32))

        scale = 1.0 / math.sqrt(dh)
        q = (proj(wq_ref, bq_ref) * scale).astype(cdt).reshape(bt, seq, dim)
        k = proj(wk_ref, bk_ref).astype(cdt).reshape(bt, seq, dim)
        v = proj(wv_ref, bv_ref).astype(cdt).reshape(bt, seq, dim)

        # Single static (S, S) causal mask — no block-diagonal construction.
        row = jax.lax.broadcasted_iota(jnp.int32, (seq, seq), 0)
        col = jax.lax.broadcasted_iota(jnp.int32, (seq, seq), 1)
        causal = col <= row

        # Per-head, per-sequence attention; each head's output is staged
        # directly in VMEM (h2_ref) so no list/concatenate stays live.
        for hh in range(heads):
            sl = slice(hh * dh, (hh + 1) * dh)
            s = jnp.einsum("bqd,bkd->bqk", q[:, :, sl], k[:, :, sl],
                           preferred_element_type=jnp.float32)
            s = jnp.where(causal[None], s, _MASK_VALUE)
            s = s - jnp.max(s, axis=-1, keepdims=True)
            p = jnp.exp(s)
            p = p * pl.reciprocal(jnp.sum(p, axis=-1, keepdims=True), approx=True)
            o = jnp.einsum("bqk,bkd->bqd", p.astype(cdt), v[:, :, sl],
                           preferred_element_type=jnp.float32)
            h2_ref[:, sl] = o.reshape(n, dh).astype(cdt)

        attn = (jnp.dot(h2_ref[...], wo_ref[...],
                        preferred_element_type=jnp.float32)
                + bo_ref[...].astype(jnp.float32))
        xa = x + attn
        acc_ref[...] = xa                                   # residual folded in
        h2_ref[...] = _layernorm(xa, ln2_w_ref[...], ln2_b_ref[...], eps).astype(cdt)

    # -------- every i: one I-tile of the MLP, accumulated in f32 scratch ----
    f = (jnp.dot(h2_ref[...], w1_ref[...], preferred_element_type=jnp.float32)
         + b1_ref[...].astype(jnp.float32))
    if act == "quick_gelu":
        f = f * jax.nn.sigmoid(1.702 * f)
    else:  # "gelu"
        f = jax.nn.gelu(f, approximate=False)
    acc_ref[...] += jnp.dot(f.astype(cdt), w2_ref[...],
                            preferred_element_type=jnp.float32)

    # -------- last i: bias, optional fused final LayerNorm, writeback -------
    @pl.when(i == n_i - 1)
    def _epilogue():
        y = acc_ref[...] + b2_ref[...].astype(jnp.float32)
        if apply_final_ln:
            y = _layernorm(y, fln_w_ref[...], fln_b_ref[...], eps)
        out_ref[...] = y.reshape(bt, seq, dim).astype(out_ref.dtype)


def final_ln_kernel(x_ref, w_ref, b_ref, out_ref, *, eps):
    bt, s, d = x_ref.shape
    y = _layernorm(x_ref[...].reshape(bt * s, d), w_ref[...], b_ref[...], eps)
    out_ref[...] = y.reshape(bt, s, d).astype(out_ref.dtype)


# ----------------------------------------------------------------------------
# pallas_call wrappers
# ----------------------------------------------------------------------------

def run_clip_layer(x, p, heads, *, eps, act, final_ln_w, final_ln_b,
                   apply_final_ln, vmem_cap):
    B, S, D = x.shape
    I = p["w1"].shape[1]
    assert D % heads == 0
    bt = _pick_bt(B, S)
    ti = _pick_ti(I, D, vmem_cap)
    nb, ni = B // bt, I // ti
    cdt = p["wq"].dtype

    def const2(shape):
        return pl.BlockSpec(shape, lambda b, i: (0, 0))

    in_specs = [
        pl.BlockSpec((bt, S, D), lambda b, i: (b, 0, 0)),     # x
        const2((1, D)), const2((1, D)),                       # ln1 w, b
        const2((D, D)), const2((1, D)),                       # wq, bq
        const2((D, D)), const2((1, D)),                       # wk, bk
        const2((D, D)), const2((1, D)),                       # wv, bv
        const2((D, D)), const2((1, D)),                       # wo, bo
        const2((1, D)), const2((1, D)),                       # ln2 w, b
        pl.BlockSpec((D, ti), lambda b, i: (0, i)),           # fc1 weight tile
        pl.BlockSpec((1, ti), lambda b, i: (0, i)),           # fc1 bias tile
        pl.BlockSpec((ti, D), lambda b, i: (i, 0)),           # fc2 weight tile
        const2((1, D)),                                       # fc2 bias
        const2((1, D)), const2((1, D)),                       # final LN w, b
    ]

    kernel = functools.partial(clip_layer_kernel, heads=heads, eps=eps,
                               act=act, apply_final_ln=apply_final_ln)

    # v7x megacore: split batch tiles across TensorCores when there are >= 2;
    # the I axis accumulates into acc_ref so it must stay "arbitrary".
    batch_sem = "parallel" if nb >= 2 else "arbitrary"

    return pl.pallas_call(
        kernel,
        out_shape=jax.ShapeDtypeStruct((B, S, D), x.dtype),
        grid=(nb, ni),
        in_specs=in_specs,
        out_specs=pl.BlockSpec((bt, S, D), lambda b, i: (b, 0, 0)),
        scratch_shapes=[
            pltpu.VMEM((bt * S, D), cdt),          # head staging -> LN2 output
            pltpu.VMEM((bt * S, D), jnp.float32),  # residual + fc2 accumulator
        ],
        compiler_params=pltpu.CompilerParams(
            dimension_semantics=(batch_sem, "arbitrary"),
            vmem_limit_bytes=_vmem_limit(vmem_cap)),
    )(x,
      p["ln1_w"], p["ln1_b"],
      p["wq"], p["bq"], p["wk"], p["bk"], p["wv"], p["bv"],
      p["wo"], p["bo"],
      p["ln2_w"], p["ln2_b"],
      p["w1"], p["b1"], p["w2"], p["b2"],
      final_ln_w, final_ln_b)


def run_final_ln(x, w, b, *, eps=1e-5):
    B, S, D = x.shape
    bt = _pick_bt(B, S)
    return pl.pallas_call(
        functools.partial(final_ln_kernel, eps=eps),
        out_shape=jax.ShapeDtypeStruct((B, S, D), x.dtype),
        grid=(B // bt,),
        in_specs=[
            pl.BlockSpec((bt, S, D), lambda i: (i, 0, 0)),
            pl.BlockSpec((1, D), lambda i: (0, 0)),
            pl.BlockSpec((1, D), lambda i: (0, 0)),
        ],
        out_specs=pl.BlockSpec((bt, S, D), lambda i: (i, 0, 0)),
        compiler_params=pltpu.CompilerParams(
            dimension_semantics=("parallel",)),
    )(x, w, b)


# ----------------------------------------------------------------------------
# Model glue (embeddings, pooled gather, projection) in plain JAX
# ----------------------------------------------------------------------------

def clip_text_model_forward(input_tokens, params, config,
                            intermediate_output=None,
                            final_layer_norm_intermediate=True,
                            eps=1e-5):
    heads = config["num_attention_heads"]
    L = config["num_hidden_layers"]
    act = config.get("hidden_act", "quick_gelu")
    vmem_cap = _tpu_vmem_capacity()

    # CLIPEmbeddings: token gather + position table broadcast (plain JAX).
    x = jnp.take(params["token_emb"], input_tokens, axis=0) + params["pos_emb"][None]
    x = x.astype(jnp.float32)
    B = x.shape[0]

    if intermediate_output is not None and intermediate_output < 0:
        intermediate_output = L + intermediate_output
    inter_is_last = (intermediate_output is not None and
                     intermediate_output == L - 1)
    fuse_final = not inter_is_last    # fuse final LN into last layer kernel

    intermediate = None
    for li in range(L):
        apply_fln = fuse_final and (li == L - 1)
        x = run_clip_layer(x, params["layers"][li], heads, eps=eps, act=act,
                           final_ln_w=params["final_ln_w"],
                           final_ln_b=params["final_ln_b"],
                           apply_final_ln=apply_fln,
                           vmem_cap=vmem_cap)
        if li == intermediate_output:
            intermediate = x

    if not fuse_final:
        pre_ln_x = x
        x = run_final_ln(x, params["final_ln_w"], params["final_ln_b"], eps=eps)
        intermediate = x if final_layer_norm_intermediate else pre_ln_x
    elif intermediate is not None and final_layer_norm_intermediate:
        intermediate = run_final_ln(intermediate, params["final_ln_w"],
                                    params["final_ln_b"], eps=eps)

    # pooled = hidden state at the argmax token index per batch element.
    idx = jnp.argmax(input_tokens.astype(jnp.int32), axis=-1)
    pooled = x[jnp.arange(B), idx]

    # text_projection: identity-initialized (B, D) x (D, D); B is tiny —
    # plain XLA (no MXU benefit from a kernel).
    projected = pooled @ params["text_projection"].astype(pooled.dtype)

    # CLIPTextModel.forward returns (x, intermediate, projected, pooled)
    return x, intermediate, projected, pooled


# ----------------------------------------------------------------------------
# Pure-JAX reference (same dtype policy) for a sanity check
# ----------------------------------------------------------------------------

def reference_forward(input_tokens, params, config,
                      intermediate_output=None,
                      final_layer_norm_intermediate=True, eps=1e-5):
    heads = config["num_attention_heads"]
    L = config["num_hidden_layers"]
    act = config.get("hidden_act", "quick_gelu")
    x = jnp.take(params["token_emb"], input_tokens, axis=0) + params["pos_emb"][None]
    x = x.astype(jnp.float32)
    B, S, D = x.shape
    dh = D // heads
    scale = 1.0 / math.sqrt(dh)
    causal = jnp.arange(S)[None, :] <= jnp.arange(S)[:, None]

    def linear(v, w, b):
        y = jnp.einsum("...d,df->...f", v.astype(w.dtype), w,
                       preferred_element_type=jnp.float32)
        return y + b.astype(jnp.float32)

    if intermediate_output is not None and intermediate_output < 0:
        intermediate_output = L + intermediate_output
    inter = None
    for li in range(L):
        p = params["layers"][li]
        cdt = p["wq"].dtype
        h = _layernorm(x, p["ln1_w"], p["ln1_b"], eps)
        q = (linear(h, p["wq"], p["bq"]) * scale)
        k = linear(h, p["wk"], p["bk"])
        v = linear(h, p["wv"], p["bv"])
        q = q.reshape(B, S, heads, dh).transpose(0, 2, 1, 3).astype(cdt)
        k = k.reshape(B, S, heads, dh).transpose(0, 2, 1, 3).astype(cdt)
        v = v.reshape(B, S, heads, dh).transpose(0, 2, 1, 3).astype(cdt)
        s = jnp.einsum("bhqd,bhkd->bhqk", q, k, preferred_element_type=jnp.float32)
        s = jnp.where(causal[None, None], s, _MASK_VALUE)
        a = jax.nn.softmax(s, axis=-1)
        o = jnp.einsum("bhqk,bhkd->bhqd", a.astype(cdt), v,
                       preferred_element_type=jnp.float32)
        o = o.transpose(0, 2, 1, 3).reshape(B, S, D)
        x = x + linear(o, p["wo"], p["bo"])
        h2 = _layernorm(x, p["ln2_w"], p["ln2_b"], eps)
        f = linear(h2, p["w1"], p["b1"])
        if act == "quick_gelu":
            f = f * jax.nn.sigmoid(1.702 * f)
        else:
            f = jax.nn.gelu(f, approximate=False)
        x = x + linear(f, p["w2"], p["b2"])
        if li == intermediate_output:
            inter = x
    x = _layernorm(x, params["final_ln_w"], params["final_ln_b"], eps)
    if inter is not None and final_layer_norm_intermediate:
        inter = _layernorm(inter, params["final_ln_w"], params["final_ln_b"], eps)
    idx = jnp.argmax(input_tokens.astype(jnp.int32), axis=-1)
    pooled = x[jnp.arange(B), idx]
    projected = pooled @ params["text_projection"].astype(pooled.dtype)
    return x, inter, projected, pooled


# ----------------------------------------------------------------------------
# Deterministic parameter init (weights in bf16, LN params in f32)
# ----------------------------------------------------------------------------

def init_params(key, config, vocab_size, num_positions,
                param_dtype=jnp.bfloat16):
    D = config["hidden_size"]
    I = config["intermediate_size"]
    L = config["num_hidden_layers"]
    scale = 0.02

    keys = jax.random.split(key, 2 + L)
    token_emb = scale * jax.random.normal(keys[0], (vocab_size, D), jnp.float32)
    pos_emb = scale * jax.random.normal(keys[1], (num_positions, D), jnp.float32)

    layers = []
    for li in range(L):
        lk = jax.random.split(keys[2 + li], 10)

        def lin(k, din, dout):
            return (scale * jax.random.normal(k, (din, dout), jnp.float32)
                    ).astype(param_dtype)

        layers.append(dict(
            ln1_w=(1.0 + 0.01 * jax.random.normal(lk[6], (1, D))).astype(jnp.float32),
            ln1_b=(0.01 * jax.random.normal(lk[7], (1, D))).astype(jnp.float32),
            wq=lin(lk[0], D, D),
            bq=(0.01 * jax.random.normal(lk[8], (1, D))).astype(param_dtype),
            wk=lin(lk[1], D, D), bk=jnp.zeros((1, D), param_dtype),
            wv=lin(lk[2], D, D), bv=jnp.zeros((1, D), param_dtype),
            wo=lin(lk[3], D, D), bo=jnp.zeros((1, D), param_dtype),
            ln2_w=jnp.ones((1, D), jnp.float32),
            ln2_b=jnp.zeros((1, D), jnp.float32),
            w1=lin(lk[4], D, I),
            b1=(0.01 * jax.random.normal(lk[9], (1, I))).astype(param_dtype),
            w2=lin(lk[5], I, D), b2=jnp.zeros((1, D), param_dtype),
        ))

    return dict(
        token_emb=token_emb,
        pos_emb=pos_emb,
        layers=layers,
        final_ln_w=jnp.ones((1, D), jnp.float32),
        final_ln_b=jnp.zeros((1, D), jnp.float32),
        # module __init__ copies torch.eye into text_projection.weight
        text_projection=jnp.eye(D, dtype=jnp.float32),
    )


# ----------------------------------------------------------------------------
# Main
# ----------------------------------------------------------------------------

if __name__ == "__main__":
    config = dict(
        num_hidden_layers=2,
        hidden_size=32,
        num_attention_heads=4,
        intermediate_size=64,
        hidden_act="quick_gelu",
    )
    B, S = 2, 8            # sequence length == num_positions (stand-in for 77)
    vocab_size = 100

    key = jax.random.PRNGKey(0)
    pkey, tkey = jax.random.split(key)
    params = init_params(pkey, config, vocab_size=vocab_size, num_positions=S)
    tokens = jax.random.randint(tkey, (B, S), 0, vocab_size, dtype=jnp.int32)

    D = config["hidden_size"]

    # Path 1: no intermediate -> final LayerNorm fused into the last layer.
    x_out, inter, projected, pooled = clip_text_model_forward(tokens, params, config)
    jax.block_until_ready((x_out, projected, pooled))
    assert x_out.shape == (B, S, D) and inter is None
    assert projected.shape == (B, D) and pooled.shape == (B, D)

    # Sanity check against a pure-JAX reference with the same dtype policy.
    rx, _, rp, rpool = reference_forward(tokens, params, config)
    assert jnp.allclose(x_out, rx, rtol=2e-2, atol=2e-2)
    assert jnp.allclose(pooled, rpool, rtol=2e-2, atol=2e-2)
    assert jnp.allclose(projected, rp, rtol=2e-2, atol=2e-2)

    # Path 2: intermediate from the last layer -> standalone final-LN kernel.
    x2, inter2, proj2, pool2 = clip_text_model_forward(
        tokens, params, config, intermediate_output=-1)
    jax.block_until_ready((x2, inter2, proj2, pool2))
    assert inter2.shape == (B, S, D)
    assert jnp.allclose(x2, x_out, rtol=2e-2, atol=2e-2)
    assert jnp.allclose(inter2, x2, rtol=2e-2, atol=2e-2)

    print("KERNEL_OK")
</pallas_src>

<mosaic_0001>
module attributes {stable_mosaic.version = 11 : i64} {
  func.func @clip_layer_kernel(%arg0: i32, %arg1: i32, %arg2: memref<2x8x32xf32, #tpu.memory_space<vmem>>, %arg3: memref<1x32xf32, #tpu.memory_space<vmem>>, %arg4: memref<1x32xf32, #tpu.memory_space<vmem>>, %arg5: memref<32x32xbf16, #tpu.memory_space<vmem>>, %arg6: memref<1x32xbf16, #tpu.memory_space<vmem>>, %arg7: memref<32x32xbf16, #tpu.memory_space<vmem>>, %arg8: memref<1x32xbf16, #tpu.memory_space<vmem>>, %arg9: memref<32x32xbf16, #tpu.memory_space<vmem>>, %arg10: memref<1x32xbf16, #tpu.memory_space<vmem>>, %arg11: memref<32x32xbf16, #tpu.memory_space<vmem>>, %arg12: memref<1x32xbf16, #tpu.memory_space<vmem>>, %arg13: memref<1x32xf32, #tpu.memory_space<vmem>>, %arg14: memref<1x32xf32, #tpu.memory_space<vmem>>, %arg15: memref<32x64xbf16, #tpu.memory_space<vmem>>, %arg16: memref<1x64xbf16, #tpu.memory_space<vmem>>, %arg17: memref<64x32xbf16, #tpu.memory_space<vmem>>, %arg18: memref<1x32xbf16, #tpu.memory_space<vmem>>, %arg19: memref<1x32xf32, #tpu.memory_space<vmem>>, %arg20: memref<1x32xf32, #tpu.memory_space<vmem>>, %arg21: memref<2x8x32xf32, #tpu.memory_space<vmem>>, %arg22: memref<16x32xbf16, #tpu.memory_space<vmem>>, %arg23: memref<16x32xf32, #tpu.memory_space<vmem>>) attributes {dimension_semantics = [#tpu.dimension_semantics<arbitrary>, #tpu.dimension_semantics<arbitrary>], iteration_bounds = array<i64: 1, 1>, scalar_prefetch = 0 : i64, scratch_operands = 2 : i64, tpu.core_type = #tpu.core_type<tc>, window_params = [{transform_indices = @transform_0, window_bounds = array<i64: 2, 8, 32>}, {pipeline_mode = #tpu.pipeline_mode<synchronous>, transform_indices = @transform_1, window_bounds = array<i64: 1, 32>}, {pipeline_mode = #tpu.pipeline_mode<synchronous>, transform_indices = @transform_2, window_bounds = array<i64: 1, 32>}, {pipeline_mode = #tpu.pipeline_mode<synchronous>, transform_indices = @transform_3, window_bounds = array<i64: 32, 32>}, {pipeline_mode = #tpu.pipeline_mode<synchronous>, transform_indices = @transform_4, window_bounds = array<i64: 1, 32>}, {pipeline_mode = #tpu.pipeline_mode<synchronous>, transform_indices = @transform_5, window_bounds = array<i64: 32, 32>}, {pipeline_mode = #tpu.pipeline_mode<synchronous>, transform_indices = @transform_6, window_bounds = array<i64: 1, 32>}, {pipeline_mode = #tpu.pipeline_mode<synchronous>, transform_indices = @transform_7, window_bounds = array<i64: 32, 32>}, {pipeline_mode = #tpu.pipeline_mode<synchronous>, transform_indices = @transform_8, window_bounds = array<i64: 1, 32>}, {pipeline_mode = #tpu.pipeline_mode<synchronous>, transform_indices = @transform_9, window_bounds = array<i64: 32, 32>}, {pipeline_mode = #tpu.pipeline_mode<synchronous>, transform_indices = @transform_10, window_bounds = array<i64: 1, 32>}, {pipeline_mode = #tpu.pipeline_mode<synchronous>, transform_indices = @transform_11, window_bounds = array<i64: 1, 32>}, {pipeline_mode = #tpu.pipeline_mode<synchronous>, transform_indices = @transform_12, window_bounds = array<i64: 1, 32>}, {transform_indices = @transform_13, window_bounds = array<i64: 32, 64>}, {transform_indices = @transform_14, window_bounds = array<i64: 1, 64>}, {transform_indices = @transform_15, window_bounds = array<i64: 64, 32>}, {pipeline_mode = #tpu.pipeline_mode<synchronous>, transform_indices = @transform_16, window_bounds = array<i64: 1, 32>}, {pipeline_mode = #tpu.pipeline_mode<synchronous>, transform_indices = @transform_17, window_bounds = array<i64: 1, 32>}, {pipeline_mode = #tpu.pipeline_mode<synchronous>, transform_indices = @transform_18, window_bounds = array<i64: 1, 32>}, {transform_indices = @transform_19, window_bounds = array<i64: 2, 8, 32>}]} {
    %c0_i32 = arith.constant 0 : i32
    %0 = arith.cmpi eq, %arg1, %c0_i32 : i32
    %1 = arith.extui %0 : i1 to i32
    %c0_i32_0 = arith.constant 0 : i32
    %2 = arith.cmpi ne, %1, %c0_i32_0 : i32
    scf.if %2 {
      %c0_17 = arith.constant 0 : index
      %c0_18 = arith.constant 0 : index
      %c0_19 = arith.constant 0 : index
      %27 = vector.load %arg2[%c0_17, %c0_18, %c0_19] : memref<2x8x32xf32, #tpu.memory_space<vmem>>, vector<2x8x32xf32>
      %28 = vector.shape_cast %27 : vector<2x8x32xf32> to vector<16x32xf32>
      %c0_20 = arith.constant 0 : index
      %c0_21 = arith.constant 0 : index
      %29 = vector.load %arg3[%c0_20, %c0_21] : memref<1x32xf32, #tpu.memory_space<vmem>>, vector<1x32xf32>
      %c0_22 = arith.constant 0 : index
      %c0_23 = arith.constant 0 : index
      %30 = vector.load %arg4[%c0_22, %c0_23] : memref<1x32xf32, #tpu.memory_space<vmem>>, vector<1x32xf32>
      %cst_24 = arith.constant dense<0.000000e+00> : vector<16xf32>
      %31 = vector.multi_reduction <add>, %28, %cst_24 [1] : vector<16x32xf32> to vector<16xf32>
      %32 = vector.shape_cast %31 : vector<16xf32> to vector<16x1xf32>
      %cst_25 = arith.constant 3.200000e+01 : f32
      %33 = vector.broadcast %cst_25 : f32 to vector<16x1xf32>
      %34 = arith.divf %32, %33 : vector<16x1xf32>
      %35 = vector.broadcast %34 : vector<16x1xf32> to vector<16x32xf32>
      %36 = arith.subf %28, %35 : vector<16x32xf32>
      %37 = arith.mulf %36, %36 : vector<16x32xf32>
      %cst_26 = arith.constant dense<0.000000e+00> : vector<16xf32>
      %38 = vector.multi_reduction <add>, %37, %cst_26 [1] : vector<16x32xf32> to vector<16xf32>
      %39 = vector.shape_cast %38 : vector<16xf32> to vector<16x1xf32>
      %cst_27 = arith.constant 3.200000e+01 : f32
      %40 = vector.broadcast %cst_27 : f32 to vector<16x1xf32>
      %41 = arith.divf %39, %40 : vector<16x1xf32>
      %42 = vector.broadcast %34 : vector<16x1xf32> to vector<16x32xf32>
      %43 = arith.subf %28, %42 : vector<16x32xf32>
      %cst_28 = arith.constant 9.99999974E-6 : f32
      %44 = vector.broadcast %cst_28 : f32 to vector<16x1xf32>
      %45 = arith.addf %41, %44 : vector<16x1xf32>
      %46 = math.rsqrt %45 : vector<16x1xf32>
      %47 = vector.broadcast %46 : vector<16x1xf32> to vector<16x32xf32>
      %48 = arith.mulf %43, %47 : vector<16x32xf32>
      %49 = vector.broadcast %29 : vector<1x32xf32> to vector<16x32xf32>
      %50 = arith.mulf %48, %49 : vector<16x32xf32>
      %51 = vector.broadcast %30 : vector<1x32xf32> to vector<16x32xf32>
      %52 = arith.addf %50, %51 : vector<16x32xf32>
      %53 = arith.truncf %52 : vector<16x32xf32> to vector<16x32xbf16>
      %c0_29 = arith.constant 0 : index
      %c0_30 = arith.constant 0 : index
      %54 = vector.load %arg5[%c0_29, %c0_30] : memref<32x32xbf16, #tpu.memory_space<vmem>>, vector<32x32xbf16>
      %cst_31 = arith.constant dense<0.000000e+00> : vector<16x32xf32>
      %55 = tpu.matmul %53, %54, %cst_31 {dimension_numbers = #tpu.dot_dimension_numbers<[1], [0], [0], [1], [0, 0, 1, 1], [], []>} : vector<16x32xbf16>, vector<32x32xbf16>, vector<16x32xf32> -> vector<16x32xf32>
      %c0_32 = arith.constant 0 : index
      %c0_33 = arith.constant 0 : index
      %56 = vector.load %arg6[%c0_32, %c0_33] : memref<1x32xbf16, #tpu.memory_space<vmem>>, vector<1x32xbf16>
      %57 = arith.extf %56 : vector<1x32xbf16> to vector<1x32xf32>
      %58 = vector.broadcast %57 : vector<1x32xf32> to vector<16x32xf32>
      %59 = arith.addf %55, %58 : vector<16x32xf32>
      %cst_34 = arith.constant 0.353553385 : f32
      %60 = vector.broadcast %cst_34 : f32 to vector<16x32xf32>
      %61 = arith.mulf %59, %60 : vector<16x32xf32>
      %62 = arith.truncf %61 : vector<16x32xf32> to vector<16x32xbf16>
      %63 = vector.shape_cast %62 : vector<16x32xbf16> to vector<2x8x32xbf16>
      %c0_35 = arith.constant 0 : index
      %c0_36 = arith.constant 0 : index
      %64 = vector.load %arg7[%c0_35, %c0_36] : memref<32x32xbf16, #tpu.memory_space<vmem>>, vector<32x32xbf16>
      %cst_37 = arith.constant dense<0.000000e+00> : vector<16x32xf32>
      %65 = tpu.matmul %53, %64, %cst_37 {dimension_numbers = #tpu.dot_dimension_numbers<[1], [0], [0], [1], [0, 0, 1, 1], [], []>} : vector<16x32xbf16>, vector<32x32xbf16>, vector<16x32xf32> -> vector<16x32xf32>
      %c0_38 = arith.constant 0 : index
      %c0_39 = arith.constant 0 : index
      %66 = vector.load %arg8[%c0_38, %c0_39] : memref<1x32xbf16, #tpu.memory_space<vmem>>, vector<1x32xbf16>
      %67 = arith.extf %66 : vector<1x32xbf16> to vector<1x32xf32>
      %68 = vector.broadcast %67 : vector<1x32xf32> to vector<16x32xf32>
      %69 = arith.addf %65, %68 : vector<16x32xf32>
      %70 = arith.truncf %69 : vector<16x32xf32> to vector<16x32xbf16>
      %71 = vector.shape_cast %70 : vector<16x32xbf16> to vector<2x8x32xbf16>
      %c0_40 = arith.constant 0 : index
      %c0_41 = arith.constant 0 : index
      %72 = vector.load %arg9[%c0_40, %c0_41] : memref<32x32xbf16, #tpu.memory_space<vmem>>, vector<32x32xbf16>
      %cst_42 = arith.constant dense<0.000000e+00> : vector<16x32xf32>
      %73 = tpu.matmul %53, %72, %cst_42 {dimension_numbers = #tpu.dot_dimension_numbers<[1], [0], [0], [1], [0, 0, 1, 1], [], []>} : vector<16x32xbf16>, vector<32x32xbf16>, vector<16x32xf32> -> vector<16x32xf32>
      %c0_43 = arith.constant 0 : index
      %c0_44 = arith.constant 0 : index
      %74 = vector.load %arg10[%c0_43, %c0_44] : memref<1x32xbf16, #tpu.memory_space<vmem>>, vector<1x32xbf16>
      %75 = arith.extf %74 : vector<1x32xbf16> to vector<1x32xf32>
      %76 = vector.broadcast %75 : vector<1x32xf32> to vector<16x32xf32>
      %77 = arith.addf %73, %76 : vector<16x32xf32>
      %78 = arith.truncf %77 : vector<16x32xf32> to vector<16x32xbf16>
      %79 = vector.shape_cast %78 : vector<16x32xbf16> to vector<2x8x32xbf16>
      %80 = tpu.iota {dimensions = array<i32: 0>} : vector<8x8xi32>
      %81 = tpu.iota {dimensions = array<i32: 1>} : vector<8x8xi32>
      %82 = arith.cmpi sle, %81, %80 : vector<8x8xi32>
      %83 = vector.extract_strided_slice %63 {offsets = [0, 0, 0], sizes = [2, 8, 8], strides = [1, 1, 1]} : vector<2x8x32xbf16> to vector<2x8x8xbf16>
      %84 = vector.extract_strided_slice %71 {offsets = [0, 0, 0], sizes = [2, 8, 8], strides = [1, 1, 1]} : vector<2x8x32xbf16> to vector<2x8x8xbf16>
      "tpu.trace_start"() <{level = 10 : i32, message = "bqd,bkd->bqk"}> : () -> ()
      %cst_45 = arith.constant dense<0.000000e+00> : vector<2x8x8xf32>
      %85 = tpu.matmul %83, %84, %cst_45 {dimension_numbers = #tpu.dot_dimension_numbers<[2], [2], [1], [1], [0, 0, 0, 1, 1, 1], [0], [0]>} : vector<2x8x8xbf16>, vector<2x8x8xbf16>, vector<2x8x8xf32> -> vector<2x8x8xf32>
      "tpu.trace_stop"() : () -> ()
      %86 = vector.shape_cast %82 : vector<8x8xi1> to vector<1x8x8xi1>
      %cst_46 = arith.constant -1.000000e+30 : f32
      %87 = vector.shape_cast %86 : vector<1x8x8xi1> to vector<1x8x8xi1>
      %88 = vector.broadcast %87 : vector<1x8x8xi1> to vector<2x8x8xi1>
      %89 = vector.broadcast %cst_46 : f32 to vector<2x8x8xf32>
      %90 = arith.select %88, %85, %89 : vector<2x8x8xi1>, vector<2x8x8xf32>
      %cst_47 = arith.constant dense<0xFF800000> : vector<2x8xf32>
      %91 = vector.multi_reduction <maximumf>, %90, %cst_47 [2] : vector<2x8x8xf32> to vector<2x8xf32>
      %92 = vector.shape_cast %91 : vector<2x8xf32> to vector<2x8x1xf32>
      %93 = vector.broadcast %92 : vector<2x8x1xf32> to vector<2x8x8xf32>
      %94 = arith.subf %90, %93 : vector<2x8x8xf32>
      %95 = math.exp %94 : vector<2x8x8xf32>
      %cst_48 = arith.constant dense<0.000000e+00> : vector<2x8xf32>
      %96 = vector.multi_reduction <add>, %95, %cst_48 [2] : vector<2x8x8xf32> to vector<2x8xf32>
      %97 = vector.shape_cast %96 : vector<2x8xf32> to vector<2x8x1xf32>
      %98 = tpu.reciprocal %97 {approx = true} : vector<2x8x1xf32> -> vector<2x8x1xf32>
      %99 = vector.broadcast %98 : vector<2x8x1xf32> to vector<2x8x8xf32>
      %100 = arith.mulf %95, %99 : vector<2x8x8xf32>
      %101 = arith.truncf %100 : vector<2x8x8xf32> to vector<2x8x8xbf16>
      %102 = vector.extract_strided_slice %79 {offsets = [0, 0, 0], sizes = [2, 8, 8], strides = [1, 1, 1]} : vector<2x8x32xbf16> to vector<2x8x8xbf16>
      "tpu.trace_start"() <{level = 10 : i32, message = "bqk,bkd->bqd"}> : () -> ()
      %cst_49 = arith.constant dense<0.000000e+00> : vector<2x8x8xf32>
      %103 = tpu.matmul %101, %102, %cst_49 {dimension_numbers = #tpu.dot_dimension_numbers<[2], [1], [1], [2], [0, 0, 0, 1, 1, 2], [0], [0]>} : vector<2x8x8xbf16>, vector<2x8x8xbf16>, vector<2x8x8xf32> -> vector<2x8x8xf32>
      "tpu.trace_stop"() : () -> ()
      %104 = vector.shape_cast %103 : vector<2x8x8xf32> to vector<16x8xf32>
      %105 = arith.truncf %104 : vector<16x8xf32> to vector<16x8xbf16>
      %c0_50 = arith.constant 0 : index
      %c0_51 = arith.constant 0 : index
      %106 = vector.load %arg22[%c0_50, %c0_51] : memref<16x32xbf16, #tpu.memory_space<vmem>>, vector<16x8xbf16>
      tpu.vector_store %arg22[%c0_50, %c0_51], %105 {strides = array<i32>} : memref<16x32xbf16, #tpu.memory_space<vmem>>, vector<16x8xbf16>,
      %107 = vector.extract_strided_slice %63 {offsets = [0, 0, 8], sizes = [2, 8, 8], strides = [1, 1, 1]} : vector<2x8x32xbf16> to vector<2x8x8xbf16>
      %108 = vector.extract_strided_slice %71 {offsets = [0, 0, 8], sizes = [2, 8, 8], strides = [1, 1, 1]} : vector<2x8x32xbf16> to vector<2x8x8xbf16>
      "tpu.trace_start"() <{level = 10 : i32, message = "bqd,bkd->bqk"}> : () -> ()
      %cst_52 = arith.constant dense<0.000000e+00> : vector<2x8x8xf32>
      %109 = tpu.matmul %107, %108, %cst_52 {dimension_numbers = #tpu.dot_dimension_numbers<[2], [2], [1], [1], [0, 0, 0, 1, 1, 1], [0], [0]>} : vector<2x8x8xbf16>, vector<2x8x8xbf16>, vector<2x8x8xf32> -> vector<2x8x8xf32>
      "tpu.trace_stop"() : () -> ()
      %110 = vector.shape_cast %82 : vector<8x8xi1> to vector<1x8x8xi1>
      %cst_53 = arith.constant -1.000000e+30 : f32
      %111 = vector.shape_cast %110 : vector<1x8x8xi1> to vector<1x8x8xi1>
      %112 = vector.broadcast %111 : vector<1x8x8xi1> to vector<2x8x8xi1>
      %113 = vector.broadcast %cst_53 : f32 to vector<2x8x8xf32>
      %114 = arith.select %112, %109, %113 : vector<2x8x8xi1>, vector<2x8x8xf32>
      %cst_54 = arith.constant dense<0xFF800000> : vector<2x8xf32>
      %115 = vector.multi_reduction <maximumf>, %114, %cst_54 [2] : vector<2x8x8xf32> to vector<2x8xf32>
      %116 = vector.shape_cast %115 : vector<2x8xf32> to vector<2x8x1xf32>
      %117 = vector.broadcast %116 : vector<2x8x1xf32> to vector<2x8x8xf32>
      %118 = arith.subf %114, %117 : vector<2x8x8xf32>
      %119 = math.exp %118 : vector<2x8x8xf32>
      %cst_55 = arith.constant dense<0.000000e+00> : vector<2x8xf32>
      %120 = vector.multi_reduction <add>, %119, %cst_55 [2] : vector<2x8x8xf32> to vector<2x8xf32>
      %121 = vector.shape_cast %120 : vector<2x8xf32> to vector<2x8x1xf32>
      %122 = tpu.reciprocal %121 {approx = true} : vector<2x8x1xf32> -> vector<2x8x1xf32>
      %123 = vector.broadcast %122 : vector<2x8x1xf32> to vector<2x8x8xf32>
      %124 = arith.mulf %119, %123 : vector<2x8x8xf32>
      %125 = arith.truncf %124 : vector<2x8x8xf32> to vector<2x8x8xbf16>
      %126 = vector.extract_strided_slice %79 {offsets = [0, 0, 8], sizes = [2, 8, 8], strides = [1, 1, 1]} : vector<2x8x32xbf16> to vector<2x8x8xbf16>
      "tpu.trace_start"() <{level = 10 : i32, message = "bqk,bkd->bqd"}> : () -> ()
      %cst_56 = arith.constant dense<0.000000e+00> : vector<2x8x8xf32>
      %127 = tpu.matmul %125, %126, %cst_56 {dimension_numbers = #tpu.dot_dimension_numbers<[2], [1], [1], [2], [0, 0, 0, 1, 1, 2], [0], [0]>} : vector<2x8x8xbf16>, vector<2x8x8xbf16>, vector<2x8x8xf32> -> vector<2x8x8xf32>
      "tpu.trace_stop"() : () -> ()
      %128 = vector.shape_cast %127 : vector<2x8x8xf32> to vector<16x8xf32>
      %129 = arith.truncf %128 : vector<16x8xf32> to vector<16x8xbf16>
      %c0_57 = arith.constant 0 : index
      %c8 = arith.constant 8 : index
      %130 = vector.load %arg22[%c0_57, %c8] : memref<16x32xbf16, #tpu.memory_space<vmem>>, vector<16x8xbf16>
      tpu.vector_store %arg22[%c0_57, %c8], %129 {strides = array<i32>} : memref<16x32xbf16, #tpu.memory_space<vmem>>, vector<16x8xbf16>,
      %131 = vector.extract_strided_slice %63 {offsets = [0, 0, 16], sizes = [2, 8, 8], strides = [1, 1, 1]} : vector<2x8x32xbf16> to vector<2x8x8xbf16>
      %132 = vector.extract_strided_slice %71 {offsets = [0, 0, 16], sizes = [2, 8, 8], strides = [1, 1, 1]} : vector<2x8x32xbf16> to vector<2x8x8xbf16>
      "tpu.trace_start"() <{level = 10 : i32, message = "bqd,bkd->bqk"}> : () -> ()
      %cst_58 = arith.constant dense<0.000000e+00> : vector<2x8x8xf32>
      %133 = tpu.matmul %131, %132, %cst_58 {dimension_numbers = #tpu.dot_dimension_numbers<[2], [2], [1], [1], [0, 0, 0, 1, 1, 1], [0], [0]>} : vector<2x8x8xbf16>, vector<2x8x8xbf16>, vector<2x8x8xf32> -> vector<2x8x8xf32>
      "tpu.trace_stop"() : () -> ()
      %134 = vector.shape_cast %82 : vector<8x8xi1> to vector<1x8x8xi1>
      %cst_59 = arith.constant -1.000000e+30 : f32
      %135 = vector.shape_cast %134 : vector<1x8x8xi1> to vector<1x8x8xi1>
      %136 = vector.broadcast %135 : vector<1x8x8xi1> to vector<2x8x8xi1>
      %137 = vector.broadcast %cst_59 : f32 to vector<2x8x8xf32>
      %138 = arith.select %136, %133, %137 : vector<2x8x8xi1>, vector<2x8x8xf32>
      %cst_60 = arith.constant dense<0xFF800000> : vector<2x8xf32>
      %139 = vector.multi_reduction <maximumf>, %138, %cst_60 [2] : vector<2x8x8xf32> to vector<2x8xf32>
      %140 = vector.shape_cast %139 : vector<2x8xf32> to vector<2x8x1xf32>
      %141 = vector.broadcast %140 : vector<2x8x1xf32> to vector<2x8x8xf32>
      %142 = arith.subf %138, %141 : vector<2x8x8xf32>
      %143 = math.exp %142 : vector<2x8x8xf32>
      %cst_61 = arith.constant dense<0.000000e+00> : vector<2x8xf32>
      %144 = vector.multi_reduction <add>, %143, %cst_61 [2] : vector<2x8x8xf32> to vector<2x8xf32>
      %145 = vector.shape_cast %144 : vector<2x8xf32> to vector<2x8x1xf32>
      %146 = tpu.reciprocal %145 {approx = true} : vector<2x8x1xf32> -> vector<2x8x1xf32>
      %147 = vector.broadcast %146 : vector<2x8x1xf32> to vector<2x8x8xf32>
      %148 = arith.mulf %143, %147 : vector<2x8x8xf32>
      %149 = arith.truncf %148 : vector<2x8x8xf32> to vector<2x8x8xbf16>
      %150 = vector.extract_strided_slice %79 {offsets = [0, 0, 16], sizes = [2, 8, 8], strides = [1, 1, 1]} : vector<2x8x32xbf16> to vector<2x8x8xbf16>
      "tpu.trace_start"() <{level = 10 : i32, message = "bqk,bkd->bqd"}> : () -> ()
      %cst_62 = arith.constant dense<0.000000e+00> : vector<2x8x8xf32>
      %151 = tpu.matmul %149, %150, %cst_62 {dimension_numbers = #tpu.dot_dimension_numbers<[2], [1], [1], [2], [0, 0, 0, 1, 1, 2], [0], [0]>} : vector<2x8x8xbf16>, vector<2x8x8xbf16>, vector<2x8x8xf32> -> vector<2x8x8xf32>
      "tpu.trace_stop"() : () -> ()
      %152 = vector.shape_cast %151 : vector<2x8x8xf32> to vector<16x8xf32>
      %153 = arith.truncf %152 : vector<16x8xf32> to vector<16x8xbf16>
      %c0_63 = arith.constant 0 : index
      %c16 = arith.constant 16 : index
      %154 = vector.load %arg22[%c0_63, %c16] : memref<16x32xbf16, #tpu.memory_space<vmem>>, vector<16x8xbf16>
      tpu.vector_store %arg22[%c0_63, %c16], %153 {strides = array<i32>} : memref<16x32xbf16, #tpu.memory_space<vmem>>, vector<16x8xbf16>,
      %155 = vector.extract_strided_slice %63 {offsets = [0, 0, 24], sizes = [2, 8, 8], strides = [1, 1, 1]} : vector<2x8x32xbf16> to vector<2x8x8xbf16>
      %156 = vector.extract_strided_slice %71 {offsets = [0, 0, 24], sizes = [2, 8, 8], strides = [1, 1, 1]} : vector<2x8x32xbf16> to vector<2x8x8xbf16>
      "tpu.trace_start"() <{level = 10 : i32, message = "bqd,bkd->bqk"}> : () -> ()
      %cst_64 = arith.constant dense<0.000000e+00> : vector<2x8x8xf32>
      %157 = tpu.matmul %155, %156, %cst_64 {dimension_numbers = #tpu.dot_dimension_numbers<[2], [2], [1], [1], [0, 0, 0, 1, 1, 1], [0], [0]>} : vector<2x8x8xbf16>, vector<2x8x8xbf16>, vector<2x8x8xf32> -> vector<2x8x8xf32>
      "tpu.trace_stop"() : () -> ()
      %158 = vector.shape_cast %82 : vector<8x8xi1> to vector<1x8x8xi1>
      %cst_65 = arith.constant -1.000000e+30 : f32
      %159 = vector.shape_cast %158 : vector<1x8x8xi1> to vector<1x8x8xi1>
      %160 = vector.broadcast %159 : vector<1x8x8xi1> to vector<2x8x8xi1>
      %161 = vector.broadcast %cst_65 : f32 to vector<2x8x8xf32>
      %162 = arith.select %160, %157, %161 : vector<2x8x8xi1>, vector<2x8x8xf32>
      %cst_66 = arith.constant dense<0xFF800000> : vector<2x8xf32>
      %163 = vector.multi_reduction <maximumf>, %162, %cst_66 [2] : vector<2x8x8xf32> to vector<2x8xf32>
      %164 = vector.shape_cast %163 : vector<2x8xf32> to vector<2x8x1xf32>
      %165 = vector.broadcast %164 : vector<2x8x1xf32> to vector<2x8x8xf32>
      %166 = arith.subf %162, %165 : vector<2x8x8xf32>
      %167 = math.exp %166 : vector<2x8x8xf32>
      %cst_67 = arith.constant dense<0.000000e+00> : vector<2x8xf32>
      %168 = vector.multi_reduction <add>, %167, %cst_67 [2] : vector<2x8x8xf32> to vector<2x8xf32>
      %169 = vector.shape_cast %168 : vector<2x8xf32> to vector<2x8x1xf32>
      %170 = tpu.reciprocal %169 {approx = true} : vector<2x8x1xf32> -> vector<2x8x1xf32>
      %171 = vector.broadcast %170 : vector<2x8x1xf32> to vector<2x8x8xf32>
      %172 = arith.mulf %167, %171 : vector<2x8x8xf32>
      %173 = arith.truncf %172 : vector<2x8x8xf32> to vector<2x8x8xbf16>
      %174 = vector.extract_strided_slice %79 {offsets = [0, 0, 24], sizes = [2, 8, 8], strides = [1, 1, 1]} : vector<2x8x32xbf16> to vector<2x8x8xbf16>
      "tpu.trace_start"() <{level = 10 : i32, message = "bqk,bkd->bqd"}> : () -> ()
      %cst_68 = arith.constant dense<0.000000e+00> : vector<2x8x8xf32>
      %175 = tpu.matmul %173, %174, %cst_68 {dimension_numbers = #tpu.dot_dimension_numbers<[2], [1], [1], [2], [0, 0, 0, 1, 1, 2], [0], [0]>} : vector<2x8x8xbf16>, vector<2x8x8xbf16>, vector<2x8x8xf32> -> vector<2x8x8xf32>
      "tpu.trace_stop"() : () -> ()
      %176 = vector.shape_cast %175 : vector<2x8x8xf32> to vector<16x8xf32>
      %177 = arith.truncf %176 : vector<16x8xf32> to vector<16x8xbf16>
      %c0_69 = arith.constant 0 : index
      %c24 = arith.constant 24 : index
      %178 = vector.load %arg22[%c0_69, %c24] : memref<16x32xbf16, #tpu.memory_space<vmem>>, vector<16x8xbf16>
      tpu.vector_store %arg22[%c0_69, %c24], %177 {strides = array<i32>} : memref<16x32xbf16, #tpu.memory_space<vmem>>, vector<16x8xbf16>,
      %c0_70 = arith.constant 0 : index
      %c0_71 = arith.constant 0 : index
      %179 = vector.load %arg22[%c0_70, %c0_71] : memref<16x32xbf16, #tpu.memory_space<vmem>>, vector<16x32xbf16>
      %c0_72 = arith.constant 0 : index
      %c0_73 = arith.constant 0 : index
      %180 = vector.load %arg11[%c0_72, %c0_73] : memref<32x32xbf16, #tpu.memory_space<vmem>>, vector<32x32xbf16>
      %cst_74 = arith.constant dense<0.000000e+00> : vector<16x32xf32>
      %181 = tpu.matmul %179, %180, %cst_74 {dimension_numbers = #tpu.dot_dimension_numbers<[1], [0], [0], [1], [0, 0, 1, 1], [], []>} : vector<16x32xbf16>, vector<32x32xbf16>, vector<16x32xf32> -> vector<16x32xf32>
      %c0_75 = arith.constant 0 : index
      %c0_76 = arith.constant 0 : index
      %182 = vector.load %arg12[%c0_75, %c0_76] : memref<1x32xbf16, #tpu.memory_space<vmem>>, vector<1x32xbf16>
      %183 = arith.extf %182 : vector<1x32xbf16> to vector<1x32xf32>
      %184 = vector.broadcast %183 : vector<1x32xf32> to vector<16x32xf32>
      %185 = arith.addf %181, %184 : vector<16x32xf32>
      %186 = arith.addf %28, %185 : vector<16x32xf32>
      %c0_77 = arith.constant 0 : index
      %c0_78 = arith.constant 0 : index
      %187 = vector.load %arg23[%c0_77, %c0_78] : memref<16x32xf32, #tpu.memory_space<vmem>>, vector<16x32xf32>
      tpu.vector_store %arg23[%c0_77, %c0_78], %186 {strides = array<i32>} : memref<16x32xf32, #tpu.memory_space<vmem>>, vector<16x32xf32>,
      %c0_79 = arith.constant 0 : index
      %c0_80 = arith.constant 0 : index
      %188 = vector.load %arg13[%c0_79, %c0_80] : memref<1x32xf32, #tpu.memory_space<vmem>>, vector<1x32xf32>
      %c0_81 = arith.constant 0 : index
      %c0_82 = arith.constant 0 : index
      %189 = vector.load %arg14[%c0_81, %c0_82] : memref<1x32xf32, #tpu.memory_space<vmem>>, vector<1x32xf32>
      %cst_83 = arith.constant dense<0.000000e+00> : vector<16xf32>
      %190 = vector.multi_reduction <add>, %186, %cst_83 [1] : vector<16x32xf32> to vector<16xf32>
      %191 = vector.shape_cast %190 : vector<16xf32> to vector<16x1xf32>
      %cst_84 = arith.constant 3.200000e+01 : f32
      %192 = vector.broadcast %cst_84 : f32 to vector<16x1xf32>
      %193 = arith.divf %191, %192 : vector<16x1xf32>
      %194 = vector.broadcast %193 : vector<16x1xf32> to vector<16x32xf32>
      %195 = arith.subf %186, %194 : vector<16x32xf32>
      %196 = arith.mulf %195, %195 : vector<16x32xf32>
      %cst_85 = arith.constant dense<0.000000e+00> : vector<16xf32>
      %197 = vector.multi_reduction <add>, %196, %cst_85 [1] : vector<16x32xf32> to vector<16xf32>
      %198 = vector.shape_cast %197 : vector<16xf32> to vector<16x1xf32>
      %cst_86 = arith.constant 3.200000e+01 : f32
      %199 = vector.broadcast %cst_86 : f32 to vector<16x1xf32>
      %200 = arith.divf %198, %199 : vector<16x1xf32>
      %201 = vector.broadcast %193 : vector<16x1xf32> to vector<16x32xf32>
      %202 = arith.subf %186, %201 : vector<16x32xf32>
      %cst_87 = arith.constant 9.99999974E-6 : f32
      %203 = vector.broadcast %cst_87 : f32 to vector<16x1xf32>
      %204 = arith.addf %200, %203 : vector<16x1xf32>
      %205 = math.rsqrt %204 : vector<16x1xf32>
      %206 = vector.broadcast %205 : vector<16x1xf32> to vector<16x32xf32>
      %207 = arith.mulf %202, %206 : vector<16x32xf32>
      %208 = vector.broadcast %188 : vector<1x32xf32> to vector<16x32xf32>
      %209 = arith.mulf %207, %208 : vector<16x32xf32>
      %210 = vector.broadcast %189 : vector<1x32xf32> to vector<16x32xf32>
      %211 = arith.addf %209, %210 : vector<16x32xf32>
      %212 = arith.truncf %211 : vector<16x32xf32> to vector<16x32xbf16>
      %c0_88 = arith.constant 0 : index
      %c0_89 = arith.constant 0 : index
      %213 = vector.load %arg22[%c0_88, %c0_89] : memref<16x32xbf16, #tpu.memory_space<vmem>>, vector<16x32xbf16>
      tpu.vector_store %arg22[%c0_88, %c0_89], %212 {strides = array<i32>} : memref<16x32xbf16, #tpu.memory_space<vmem>>, vector<16x32xbf16>,
    } else {
    }
    %c0 = arith.constant 0 : index
    %c0_1 = arith.constant 0 : index
    %3 = vector.load %arg22[%c0, %c0_1] : memref<16x32xbf16, #tpu.memory_space<vmem>>, vector<16x32xbf16>
    %c0_2 = arith.constant 0 : index
    %c0_3 = arith.constant 0 : index
    %4 = vector.load %arg15[%c0_2, %c0_3] : memref<32x64xbf16, #tpu.memory_space<vmem>>, vector<32x64xbf16>
    %cst = arith.constant dense<0.000000e+00> : vector<16x64xf32>
    %5 = tpu.matmul %3, %4, %cst {dimension_numbers = #tpu.dot_dimension_numbers<[1], [0], [0], [1], [0, 0, 1, 1], [], []>} : vector<16x32xbf16>, vector<32x64xbf16>, vector<16x64xf32> -> vector<16x64xf32>
    %c0_4 = arith.constant 0 : index
    %c0_5 = arith.constant 0 : index
    %6 = vector.load %arg16[%c0_4, %c0_5] : memref<1x64xbf16, #tpu.memory_space<vmem>>, vector<1x64xbf16>
    %7 = arith.extf %6 : vector<1x64xbf16> to vector<1x64xf32>
    %8 = vector.broadcast %7 : vector<1x64xf32> to vector<16x64xf32>
    %9 = arith.addf %5, %8 : vector<16x64xf32>
    %cst_6 = arith.constant 1.702000e+00 : f32
    %10 = vector.broadcast %cst_6 : f32 to vector<16x64xf32>
    %11 = arith.mulf %10, %9 : vector<16x64xf32>
    %12 = arith.negf %11 : vector<16x64xf32>
    %13 = math.exp %12 : vector<16x64xf32>
    %cst_7 = arith.constant 1.000000e+00 : f32
    %14 = vector.broadcast %cst_7 : f32 to vector<16x64xf32>
    %15 = arith.addf %14, %13 : vector<16x64xf32>
    %16 = arith.divf %14, %15 : vector<16x64xf32>
    %17 = arith.mulf %9, %16 : vector<16x64xf32>
    %c0_8 = arith.constant 0 : index
    %c0_9 = arith.constant 0 : index
    %18 = vector.load %arg23[%c0_8, %c0_9] : memref<16x32xf32, #tpu.memory_space<vmem>>, vector<16x32xf32>
    %19 = arith.truncf %17 : vector<16x64xf32> to vector<16x64xbf16>
    %c0_10 = arith.constant 0 : index
    %c0_11 = arith.constant 0 : index
    %20 = vector.load %arg17[%c0_10, %c0_11] : memref<64x32xbf16, #tpu.memory_space<vmem>>, vector<64x32xbf16>
    %cst_12 = arith.constant dense<0.000000e+00> : vector<16x32xf32>
    %21 = tpu.matmul %19, %20, %cst_12 {dimension_numbers = #tpu.dot_dimension_numbers<[1], [0], [0], [1], [0, 0, 1, 1], [], []>} : vector<16x64xbf16>, vector<64x32xbf16>, vector<16x32xf32> -> vector<16x32xf32>
    %22 = arith.addf %18, %21 : vector<16x32xf32>
    %c0_13 = arith.constant 0 : index
    %c0_14 = arith.constant 0 : index
    %23 = vector.load %arg23[%c0_13, %c0_14] : memref<16x32xf32, #tpu.memory_space<vmem>>, vector<16x32xf32>
    tpu.vector_store %arg23[%c0_13, %c0_14], %22 {strides = array<i32>} : memref<16x32xf32, #tpu.memory_space<vmem>>, vector<16x32xf32>,
    %c0_i32_15 = arith.constant 0 : i32
    %24 = arith.cmpi eq, %arg1, %c0_i32_15 : i32
    %25 = arith.extui %24 : i1 to i32
    %c0_i32_16 = arith.constant 0 : i32
    %26 = arith.cmpi ne, %25, %c0_i32_16 : i32
    scf.if %26 {
      %c0_17 = arith.constant 0 : index
      %c0_18 = arith.constant 0 : index
      %27 = vector.load %arg23[%c0_17, %c0_18] : memref<16x32xf32, #tpu.memory_space<vmem>>, vector<16x32xf32>
      %c0_19 = arith.constant 0 : index
      %c0_20 = arith.constant 0 : index
      %28 = vector.load %arg18[%c0_19, %c0_20] : memref<1x32xbf16, #tpu.memory_space<vmem>>, vector<1x32xbf16>
      %29 = arith.extf %28 : vector<1x32xbf16> to vector<1x32xf32>
      %30 = vector.broadcast %29 : vector<1x32xf32> to vector<16x32xf32>
      %31 = arith.addf %27, %30 : vector<16x32xf32>
      %32 = vector.shape_cast %31 : vector<16x32xf32> to vector<2x8x32xf32>
      %c0_21 = arith.constant 0 : index
      %c0_22 = arith.constant 0 : index
      %c0_23 = arith.constant 0 : index
      %33 = vector.load %arg21[%c0_21, %c0_22, %c0_23] : memref<2x8x32xf32, #tpu.memory_space<vmem>>, vector<2x8x32xf32>
      tpu.vector_store %arg21[%c0_21, %c0_22, %c0_23], %32 {strides = array<i32>} : memref<2x8x32xf32, #tpu.memory_space<vmem>>, vector<2x8x32xf32>,
    } else {
    }
    return
  }
  func.func @transform_0(%arg0: i32, %arg1: i32) -> (i32, i32, i32) {
    %c0_i32 = arith.constant 0 : i32
    %c0_i32_0 = arith.constant 0 : i32
    %c0_i32_1 = arith.constant 0 : i32
    return %arg0, %c0_i32, %c0_i32_0 : i32, i32, i32
  }
  func.func @transform_1(%arg0: i32, %arg1: i32) -> (i32, i32) {
    %c0_i32 = arith.constant 0 : i32
    %c0_i32_0 = arith.constant 0 : i32
    %c0_i32_1 = arith.constant 0 : i32
    return %c0_i32, %c0_i32_0 : i32, i32
  }
  func.func @transform_2(%arg0: i32, %arg1: i32) -> (i32, i32) {
    %c0_i32 = arith.constant 0 : i32
    %c0_i32_0 = arith.constant 0 : i32
    %c0_i32_1 = arith.constant 0 : i32
    return %c0_i32, %c0_i32_0 : i32, i32
  }
  func.func @transform_3(%arg0: i32, %arg1: i32) -> (i32, i32) {
    %c0_i32 = arith.constant 0 : i32
    %c0_i32_0 = arith.constant 0 : i32
    %c0_i32_1 = arith.constant 0 : i32
    return %c0_i32, %c0_i32_0 : i32, i32
  }
  func.func @transform_4(%arg0: i32, %arg1: i32) -> (i32, i32) {
    %c0_i32 = arith.constant 0 : i32
    %c0_i32_0 = arith.constant 0 : i32
    %c0_i32_1 = arith.constant 0 : i32
    return %c0_i32, %c0_i32_0 : i32, i32
  }
  func.func @transform_5(%arg0: i32, %arg1: i32) -> (i32, i32) {
    %c0_i32 = arith.constant 0 : i32
    %c0_i32_0 = arith.constant 0 : i32
    %c0_i32_1 = arith.constant 0 : i32
    return %c0_i32, %c0_i32_0 : i32, i32
  }
  func.func @transform_6(%arg0: i32, %arg1: i32) -> (i32, i32) {
    %c0_i32 = arith.constant 0 : i32
    %c0_i32_0 = arith.constant 0 : i32
    %c0_i32_1 = arith.constant 0 : i32
    return %c0_i32, %c0_i32_0 : i32, i32
  }
  func.func @transform_7(%arg0: i32, %arg1: i32) -> (i32, i32) {
    %c0_i32 = arith.constant 0 : i32
    %c0_i32_0 = arith.constant 0 : i32
    %c0_i32_1 = arith.constant 0 : i32
    return %c0_i32, %c0_i32_0 : i32, i32
  }
  func.func @transform_8(%arg0: i32, %arg1: i32) -> (i32, i32) {
    %c0_i32 = arith.constant 0 : i32
    %c0_i32_0 = arith.constant 0 : i32
    %c0_i32_1 = arith.constant 0 : i32
    return %c0_i32, %c0_i32_0 : i32, i32
  }
  func.func @transform_9(%arg0: i32, %arg1: i32) -> (i32, i32) {
    %c0_i32 = arith.constant 0 : i32
    %c0_i32_0 = arith.constant 0 : i32
    %c0_i32_1 = arith.constant 0 : i32
    return %c0_i32, %c0_i32_0 : i32, i32
  }
  func.func @transform_10(%arg0: i32, %arg1: i32) -> (i32, i32) {
    %c0_i32 = arith.constant 0 : i32
    %c0_i32_0 = arith.constant 0 : i32
    %c0_i32_1 = arith.constant 0 : i32
    return %c0_i32, %c0_i32_0 : i32, i32
  }
  func.func @transform_11(%arg0: i32, %arg1: i32) -> (i32, i32) {
    %c0_i32 = arith.constant 0 : i32
    %c0_i32_0 = arith.constant 0 : i32
    %c0_i32_1 = arith.constant 0 : i32
    return %c0_i32, %c0_i32_0 : i32, i32
  }
  func.func @transform_12(%arg0: i32, %arg1: i32) -> (i32, i32) {
    %c0_i32 = arith.constant 0 : i32
    %c0_i32_0 = arith.constant 0 : i32
    %c0_i32_1 = arith.constant 0 : i32
    return %c0_i32, %c0_i32_0 : i32, i32
  }
  func.func @transform_13(%arg0: i32, %arg1: i32) -> (i32, i32) {
    %c0_i32 = arith.constant 0 : i32
    %c0_i32_0 = arith.constant 0 : i32
    return %c0_i32, %arg1 : i32, i32
  }
  func.func @transform_14(%arg0: i32, %arg1: i32) -> (i32, i32) {
    %c0_i32 = arith.constant 0 : i32
    %c0_i32_0 = arith.constant 0 : i32
    return %c0_i32, %arg1 : i32, i32
  }
  func.func @transform_15(%arg0: i32, %arg1: i32) -> (i32, i32) {
    %c0_i32 = arith.constant 0 : i32
    %c0_i32_0 = arith.constant 0 : i32
    return %arg1, %c0_i32 : i32, i32
  }
  func.func @transform_16(%arg0: i32, %arg1: i32) -> (i32, i32) {
    %c0_i32 = arith.constant 0 : i32
    %c0_i32_0 = arith.constant 0 : i32
    %c0_i32_1 = arith.constant 0 : i32
    return %c0_i32, %c0_i32_0 : i32, i32
  }
  func.func @transform_17(%arg0: i32, %arg1: i32) -> (i32, i32) {
    %c0_i32 = arith.constant 0 : i32
    %c0_i32_0 = arith.constant 0 : i32
    %c0_i32_1 = arith.constant 0 : i32
    return %c0_i32, %c0_i32_0 : i32, i32
  }
  func.func @transform_18(%arg0: i32, %arg1: i32) -> (i32, i32) {
    %c0_i32 = arith.constant 0 : i32
    %c0_i32_0 = arith.constant 0 : i32
    %c0_i32_1 = arith.constant 0 : i32
    return %c0_i32, %c0_i32_0 : i32, i32
  }
  func.func @transform_19(%arg0: i32, %arg1: i32) -> (i32, i32, i32) {
    %c0_i32 = arith.constant 0 : i32
    %c0_i32_0 = arith.constant 0 : i32
    %c0_i32_1 = arith.constant 0 : i32
    return %arg0, %c0_i32, %c0_i32_0 : i32, i32, i32
  }
}

</mosaic_0001>

<bundles_post_ra>
// kernel: tpu_custom_call.1
= control target key start
LH: loop header
LB: loop body
LE: loop exit
PB: predicated region body
PF: predicated region fallthrough
CT: control target
= control target key end

     0   :  { %s2731_s0 = inlined_call_operand.vmem [shape: f32[2,8,32], index: 0, kind: input, shape index: {}]   ;;  %s2732_s1 = inlined_call_operand.vmem [shape: f32[1,32], index: 1, kind: input, shape index: {}]   ;;  %s2733_s2 = inlined_call_operand.hbm [shape: f32[1,32], index: 2, kind: input, shape index: {}]   ;;  %s2734_s3 = inlined_call_operand.vmem [shape: bf16[32,32], index: 3, kind: input, shape index: {}]   ;;  %s2735_s4 = inlined_call_operand.hbm [shape: bf16[1,32], index: 4, kind: input, shape index: {}]   ;;  %s2736_s5 = inlined_call_operand.vmem [shape: bf16[32,32], index: 5, kind: input, shape index: {}]   ;;  %s2737_s6 = inlined_call_operand.hbm [shape: bf16[1,32], index: 6, kind: input, shape index: {}]   ;;  %s2738_s7 = inlined_call_operand.hbm [shape: bf16[32,32], index: 7, kind: input, shape index: {}]   ;;  %s2739_s8 = inlined_call_operand.hbm [shape: bf16[1,32], index: 8, kind: input, shape index: {}]   ;;  %s2740_s9 = inlined_call_operand.vmem [shape: bf16[32,32], index: 9, kind: input, shape index: {}]   ;;  %s2741_s10 = inlined_call_operand.hbm [shape: bf16[1,32], index: 10, kind: input, shape index: {}]   ;;  %s2742_s11 = inlined_call_operand.hbm [shape: f32[1,32], index: 11, kind: input, shape index: {}]   ;;  %s2743_s12 = inlined_call_operand.hbm [shape: f32[1,32], index: 12, kind: input, shape index: {}]   ;;  %s2744_s13 = inlined_call_operand.vmem [shape: bf16[32,64], index: 13, kind: input, shape index: {}]   ;;  %s2745_s14 = inlined_call_operand.vmem [shape: bf16[1,64], index: 14, kind: input, shape index: {}]   ;;  %s2746_s15 = inlined_call_operand.vmem [shape: bf16[64,32], index: 15, kind: input, shape index: {}]   ;;  %s2747_s16 = inlined_call_operand.vmem [shape: bf16[1,32], index: 16, kind: input, shape index: {}]   ;;  %s2748_s17 = inlined_call_operand.vmem [shape: f32[1,32], index: 17, kind: input, shape index: {}]   ;;  %s2749_s18 = inlined_call_operand.vmem [shape: f32[1,32], index: 18, kind: input, shape index: {}]   ;;  %s2750_s19 = inlined_call_operand.hbm [shape: f32[2,8,32], index: 19, kind: output, shape index: {}]  }
   0x1   :  { %2754 = sst [smem:[#allocation25_spill]] %s2731_s0 }
   0x2   :  { %2755 = sst [smem:[#allocation26_spill]] %s2732_s1 }
   0x3   :  { %2756 = sst [smem:[#allocation27_spill]] %s2733_s2 }
   0x4   :  { %2757 = sst [smem:[#allocation28_spill]] %s2734_s3 }
   0x5   :  { %24 = vsyncpa [#allocation5], 0 }
   0x6   :  { %25 = vsyncpa [#allocation8], 0 }
   0x7   :  { %26 = vsyncpa [#allocation11], 0 }
   0x8   :  { %27 = vsyncpa [#allocation14], 0 }
   0x9   :  { %28 = vsyncpa [#allocation17], 0 }
   0xa   :  { %29 = vsyncpa [#allocation6], 0  ;;  %s2199_s0 = smov [#allocation7]   ;;  %s2200_s20 = smov [#allocation10]  }
   0xb   :  { %s52_s30 = sshll.u32 %s2199_s0, 4  ;;  %s73_s21 = sshll.u32 %s2200_s20, 4  ;;  %s53_s30 = int_to_ptr.vmem [resolvable:$true] %s52_s30  ;;  %s2319_s21 = int_to_ptr.vmem [resolvable:$true] %s73_s21 }
   0xc   :  { %s1989_s18 = scalar_lea.hbm %s2735_s4, 16 }
   0xd   :  { %p1990_p0 = scmp.ne.s32.totalorder %s2735_s4, %s1989_s18  ;;  %p1993_p1 = scmp.lt.u32.totalorder %s1989_s18, %s2735_s4 }
   0xf   :  { %p1995_p2 = pnand %p1993_p1, %p1990_p0 }
  0x11   :  { %1998 = shalt.err (!%p1995_p2)
}
  0x12   :  { %s1999_s25 = scalar_lea.vmem %s53_s30, 16  ;;  %s2003_s3 = scalar_lea.vmem %s53_s30, 32 }
  0x13   :  { %p2000_p3 = scmp.ne.s32.totalorder %s53_s30, %s1999_s25  ;;  %p2004_p4 = scmp.lt.s32.totalorder %s53_s30, %s53_s30 }
  0x14   :  { %p2005_p5 = scmp.lt.s32.totalorder %s2003_s3, %s1999_s25 }
  0x16   :  { %p2006_p6 = por %p2005_p5, %p2004_p4 }
  0x18   :  { %p2007_p7 = pnand %p2006_p6, %p2000_p3 }
  0x1a   :  { %2010 = shalt.err (!%p2007_p7)
}
  0x1b   :  { %55 = dma.hbm_to_vmem [thread:$0]  %s2735_s4, 16, %s53_s30, [#allocation8]  }
  0x1c   :  { %s2011_s0 = scalar_lea.hbm %s2738_s7, 256 }
  0x1d   :  { %p2012_p8 = scmp.ne.s32.totalorder %s2738_s7, %s2011_s0  ;;  %p2015_p9 = scmp.lt.u32.totalorder %s2011_s0, %s2738_s7 }
  0x1f   :  { %p2017_p10 = pnand %p2015_p9, %p2012_p8 }
  0x21   :  { %2020 = shalt.err (!%p2017_p10)
}
  0x22   :  { %s2021_s22 = scalar_lea.vmem %s2319_s21, 256  ;;  %p2026_p12 = scmp.lt.s32.totalorder %s2319_s21, %s2319_s21 }
  0x23   :  { %p2022_p11 = scmp.ne.s32.totalorder %s2319_s21, %s2021_s22  ;;  %p2027_p13 = scmp.lt.s32.totalorder %s2021_s22, %s2021_s22 }
  0x25   :  { %p2028_p0 = por %p2027_p13, %p2026_p12 }
  0x27   :  { %p2029_p1 = pnand %p2028_p0, %p2022_p11 }
  0x29   :  { %2032 = shalt.err (!%p2029_p1)
}
  0x2a   :  { %s2201_s4 = smov 64   ;;  %s2202_s30 = smov 4  }
  0x2b   :  { %79 = dma.hbm_to_vmem [thread:$0]  %s2738_s7, 256, %s2319_s21, [#allocation11], %s2201_s4, %s2201_s4, %s2202_s30  }
  0x2c   :  { %s2203_s24 = smov [#allocation13]   ;;  %s2204_s3 = smov [#allocation4]  }
  0x2d   :  { %s98_s25 = sshll.u32 %s2203_s24, 4  ;;  %s40_s26 = sshll.u32 %s2204_s3, 4  ;;  %s99_s25 = int_to_ptr.vmem [resolvable:$true] %s98_s25  ;;  %s41_s26 = int_to_ptr.vmem [resolvable:$true] %s40_s26 }
  0x2e   :  { %s2033_s29 = scalar_lea.hbm %s2741_s10, 16 }
  0x2f   :  { %p2034_p2 = scmp.ne.s32.totalorder %s2741_s10, %s2033_s29  ;;  %p2037_p3 = scmp.lt.u32.totalorder %s2033_s29, %s2741_s10 }
  0x31   :  { %p2039_p4 = pnand %p2037_p3, %p2034_p2 }
  0x33   :  { %2042 = shalt.err (!%p2039_p4)
}
  0x34   :  { %s2043_s7 = scalar_lea.vmem %s99_s25, 16  ;;  %s2047_s21 = scalar_lea.vmem %s99_s25, 32 }
  0x35   :  { %p2044_p5 = scmp.ne.s32.totalorder %s99_s25, %s2043_s7  ;;  %p2048_p6 = scmp.lt.s32.totalorder %s99_s25, %s99_s25 }
  0x36   :  { %p2049_p7 = scmp.lt.s32.totalorder %s2047_s21, %s2043_s7 }
  0x38   :  { %p2050_p8 = por %p2049_p7, %p2048_p6 }
  0x3a   :  { %p2051_p9 = pnand %p2050_p8, %p2044_p5 }
  0x3c   :  { %2054 = shalt.err (!%p2051_p9)
}
  0x3d   :  { %101 = dma.hbm_to_vmem [thread:$0]  %s2741_s10, 16, %s99_s25, [#allocation14]  }
  0x3e   :  { %s2758_s2 = sld [smem:[#allocation27_spill]] }
  0x44   :  { %s2055_s23 = scalar_lea.hbm %s2758_s2, 16 }
  0x45   :  { %p2056_p10 = scmp.ne.s32.totalorder %s2758_s2, %s2055_s23  ;;  %p2059_p11 = scmp.lt.u32.totalorder %s2055_s23, %s2758_s2 }
  0x47   :  { %p2061_p12 = pnand %p2059_p11, %p2056_p10 }
  0x49   :  { %2064 = shalt.err (!%p2061_p12)
}
  0x4a   :  { %s2065_s29 = scalar_lea.vmem %s41_s26, 16  ;;  %s2069_s0 = scalar_lea.vmem %s41_s26, 32 }
  0x4b   :  { %p2066_p13 = scmp.ne.s32.totalorder %s41_s26, %s2065_s29  ;;  %p2070_p0 = scmp.lt.s32.totalorder %s41_s26, %s41_s26 }
  0x4c   :  { %p2071_p1 = scmp.lt.s32.totalorder %s2069_s0, %s2065_s29 }
  0x4e   :  { %p2072_p2 = por %p2071_p1, %p2070_p0 }
  0x50   :  { %p2073_p3 = pnand %p2072_p2, %p2066_p13 }
  0x52   :  { %2076 = shalt.err (!%p2073_p3)
}
  0x53   :  { %43 = dma.hbm_to_vmem [thread:$0]  %s2758_s2, 16, %s41_s26, [#allocation5]  }
  0x54   :  { %s2205_s20 = smov [#allocation9]   ;;  %s2206_s1 = smov [#allocation12]  }
  0x55   :  { %s64_s17 = sshll.u32 %s2205_s20, 4  ;;  %s86_s7 = sshll.u32 %s2206_s1, 4  ;;  %s65_s17 = int_to_ptr.vmem [resolvable:$true] %s64_s17  ;;  %s87_s7 = int_to_ptr.vmem [resolvable:$true] %s86_s7 }
  0x56   :  { %s2077_s22 = scalar_lea.hbm %s2737_s6, 16 }
  0x57   :  { %p2078_p4 = scmp.ne.s32.totalorder %s2737_s6, %s2077_s22  ;;  %p2081_p5 = scmp.lt.u32.totalorder %s2077_s22, %s2737_s6 }
  0x59   :  { %p2083_p6 = pnand %p2081_p5, %p2078_p4 }
  0x5b   :  { %2086 = shalt.err (!%p2083_p6)
}
  0x5c   :  { %s2087_s26 = scalar_lea.vmem %s65_s17, 16  ;;  %s2091_s2 = scalar_lea.vmem %s65_s17, 32 }
  0x5d   :  { %p2088_p7 = scmp.ne.s32.totalorder %s65_s17, %s2087_s26  ;;  %p2092_p8 = scmp.lt.s32.totalorder %s65_s17, %s65_s17 }
  0x5e   :  { %p2093_p9 = scmp.lt.s32.totalorder %s2091_s2, %s2087_s26 }
  0x60   :  { %p2094_p10 = por %p2093_p9, %p2092_p8 }
  0x62   :  { %p2095_p11 = pnand %p2094_p10, %p2088_p7 }
  0x64   :  { %2098 = shalt.err (!%p2095_p11)
}
  0x65   :  { %67 = dma.hbm_to_vmem [thread:$0]  %s2737_s6, 16, %s65_s17, [#allocation8]  }
  0x66   :  { %s2099_s0 = scalar_lea.hbm %s2739_s8, 16 }
  0x67   :  { %p2100_p12 = scmp.ne.s32.totalorder %s2739_s8, %s2099_s0  ;;  %p2103_p13 = scmp.lt.u32.totalorder %s2099_s0, %s2739_s8 }
  0x69   :  { %p2105_p0 = pnand %p2103_p13, %p2100_p12 }
  0x6b   :  { %2108 = shalt.err (!%p2105_p0)
}
  0x6c   :  { %s2109_s21 = scalar_lea.vmem %s87_s7, 16  ;;  %s2113_s18 = scalar_lea.vmem %s87_s7, 32 }
  0x6d   :  { %p2110_p1 = scmp.ne.s32.totalorder %s87_s7, %s2109_s21  ;;  %p2114_p2 = scmp.lt.s32.totalorder %s87_s7, %s87_s7 }
  0x6e   :  { %p2115_p3 = scmp.lt.s32.totalorder %s2113_s18, %s2109_s21 }
  0x70   :  { %p2116_p4 = por %p2115_p3, %p2114_p2 }
  0x72   :  { %p2117_p5 = pnand %p2116_p4, %p2110_p1 }
  0x74   :  { %2120 = shalt.err (!%p2117_p5)
}
  0x75   :  { %89 = dma.hbm_to_vmem [thread:$0]  %s2739_s8, 16, %s87_s7, [#allocation11]  }
  0x76   :  { %s2207_s22 = smov [#allocation15]   ;;  %s2208_s30 = smov [#allocation16]  }
  0x77   :  { %s108_s4 = sshll.u32 %s2207_s22, 4  ;;  %s118_s23 = sshll.u32 %s2208_s30, 4  ;;  %s109_s4 = int_to_ptr.vmem [resolvable:$true] %s108_s4  ;;  %s119_s23 = int_to_ptr.vmem [resolvable:$true] %s118_s23 }
  0x78   :  { %s2121_s2 = scalar_lea.hbm %s2742_s11, 16 }
  0x79   :  { %p2122_p6 = scmp.ne.s32.totalorder %s2742_s11, %s2121_s2  ;;  %p2125_p7 = scmp.lt.u32.totalorder %s2121_s2, %s2742_s11 }
  0x7b   :  { %p2127_p8 = pnand %p2125_p7, %p2122_p6 }
  0x7d   :  { %2130 = shalt.err (!%p2127_p8)
}
  0x7e   :  { %s2131_s8 = scalar_lea.vmem %s109_s4, 16  ;;  %s2135_s7 = scalar_lea.vmem %s109_s4, 32 }
  0x7f   :  { %p2132_p9 = scmp.ne.s32.totalorder %s109_s4, %s2131_s8  ;;  %p2136_p10 = scmp.lt.s32.totalorder %s109_s4, %s109_s4 }
  0x80   :  { %p2137_p11 = scmp.lt.s32.totalorder %s2135_s7, %s2131_s8 }
  0x82   :  { %p2138_p12 = por %p2137_p11, %p2136_p10 }
  0x84   :  { %p2139_p13 = pnand %p2138_p12, %p2132_p9 }
  0x86   :  { %2142 = shalt.err (!%p2139_p13)
}
  0x87   :  { %111 = dma.hbm_to_vmem [thread:$0]  %s2742_s11, 16, %s109_s4, [#allocation14]  }
  0x88   :  { %s2143_s1 = scalar_lea.hbm %s2743_s12, 16 }
  0x89   :  { %p2144_p0 = scmp.ne.s32.totalorder %s2743_s12, %s2143_s1  ;;  %p2147_p1 = scmp.lt.u32.totalorder %s2143_s1, %s2743_s12 }
  0x8b   :  { %p2149_p2 = pnand %p2147_p1, %p2144_p0 }
  0x8d   :  { %2152 = shalt.err (!%p2149_p2)
}
  0x8e   :  { %s2153_s22 = scalar_lea.vmem %s119_s23, 16  ;;  %s2157_s30 = scalar_lea.vmem %s119_s23, 32 }
  0x8f   :  { %p2154_p3 = scmp.ne.s32.totalorder %s119_s23, %s2153_s22  ;;  %p2158_p4 = scmp.lt.s32.totalorder %s119_s23, %s119_s23 }
  0x90   :  { %p2159_p5 = scmp.lt.s32.totalorder %s2157_s30, %s2153_s22 }
  0x92   :  { %p2160_p6 = por %p2159_p5, %p2158_p4 }
  0x94   :  { %p2161_p7 = pnand %p2160_p6, %p2154_p3 }
  0x96   :  { %2164 = shalt.err (!%p2161_p7)
}
  0x97   :  { %121 = dma.hbm_to_vmem [thread:$0]  %s2743_s12, 16, %s119_s23, [#allocation17]  }
  0x98   :  { %2187 = dma.done.wait [#allocation5], 16  }
  0x99   :  { %2188 = vsyncadd [#allocation5], 4294967280 }
  0x9a   :  { %2189 = dma.done.wait [#allocation8], 32  }
  0x9b   :  { %2190 = vsyncadd [#allocation8], 4294967264 }
  0x9c   :  { %2191 = dma.done.wait [#allocation11], 272  }
  0x9d   :  { %2192 = vsyncadd [#allocation11], 4294967024 }
  0x9e   :  { %2193 = dma.done.wait [#allocation14], 32  }
  0x9f   :  { %2194 = vsyncadd [#allocation14], 4294967264 }
  0xa0   :  { %2195 = dma.done.wait [#allocation17], 16  }
  0xa1   :  { %2196 = vsyncadd [#allocation17], 4294967280  ;;  %vm167_vm0 = vcmask 261120   ;;  %s2759_s2 = sld [smem:[#allocation25_spill]]  ;;  %s2760_s28 = sld [smem:[#allocation28_spill]]  ;;  %v1928_v15 = vld [vmem:[%s2736_s5] sm:$0xff]   ;;  %v218_v38 = vlaneseq }
  0xa2   :  { %v2209_v16 = vmov 0.0   ;;  %v1930_v18 = vld [vmem:[%s2736_s5 + $0x8] sm:$0xff]   ;;  %vm2210_vm1 = vmmov 0   ;;  %s2761_s1 = sld [smem:[#allocation26_spill]]  ;;  %v1654_v31 = vld [vmem:[#allocation4] ss:$0 sm:$0xff] }
  0xa3   :  { %1759 = vmatprep.subr.bf16.mxu0 %v2209_v16  ;;  %1767 = vmatprep.subr.bf16.mxu1 %v2209_v16  ;;  %v1931_v35 = vld [vmem:[#allocation10] sm:$0xff]   ;;  %v1932_v37 = vld [vmem:[#allocation10 + $0x8] sm:$0xff]   ;;  %v219_v39 = vshrl.u32 %v218_v38, 7  ;;  %v290_v40 = vld [vmem:[#allocation9] sm:$0x1]  ;;  %vm429_vm2 = vcmask 64512  }
  0xa4   :  { %1768 = vmatpush3.bf16.msra.mxu1 %v1928_v15  ;;  %1763 = vmatprep.mubr.msk.bf16.mxu0 %vm2210_vm1, %v2209_v16  ;;  %v216_v41 = vld [vmem:[#allocation7] sm:$0x1]  ;;  %v291_v43 = vunpack.c.l.bf16 %v290_v40  ;;  %v359_v46 = vld [vmem:[#allocation12] sm:$0x1]  ;;  %vm553_vm3 = vcmask 1043456   ;;  %s2211_s21 = smov 120  }
  0xa5   :  { %1769 = vmatprep.subr.bf16.mxu1 %v2209_v16  ;;  %1771 = vmatprep.mubr.msk.bf16.mxu1 %vm2210_vm1, %v2209_v16  ;;  %v2476_v42 = vsub.s32 0, %v219_v39  ;;  %v217_v44 = vunpack.c.l.bf16 %v216_v41  ;;  %v360_v53 = vunpack.c.l.bf16 %v359_v46  ;;  %s2212_s18 = smov 112   ;;  %s2213_s6 = smov 104   ;;  %vm872_vm5 = vcmask 130112  }
  0xa6   :  { %s2214_s17 = smov 8   ;;  %s2215_s22 = smov 16   ;;  %vm1101_vm6 = vcmask 195712   ;;  %vm1330_vm7 = vcmask 261312   ;;  %vm1568_vm8 = vcmask 523264  }
  0xa7   :  { %v2425_v0 = vld [vmem:[%s2759_s2] sm:$0xff]  ;;  %v2430_v1 = vld [vmem:[%s2759_s2 + $0x8] sm:$0xff]  ;;  %v295_v45 = vrot.slane %v291_v43, %v2476_v42  ;;  %v221_v47 = vrot.slane %v217_v44, %v2476_v42  ;;  %s2216_s26 = smov 24   ;;  %s2217_s5 = smov [#allocation18]  }
  0xa8   :  { %v168_v2 = vsel %vm167_vm0, %v2425_v0, 0.0  ;;  %v171_v3 = vsel %vm167_vm0, %v2430_v1, 0.0  ;;  %v1927_v14 = vld [vmem:[%s2760_s28] sm:$0xff]   ;;  %v1929_v17 = vld [vmem:[%s2760_s28 + $0x8] sm:$0xff]   ;;  %1770 = vmatpush3.bf16.msra.mxu1 %v1930_v18  ;;  %s1637_s20 = sshll.u32 %s2217_s5, 4  ;;  %s1638_s20 = int_to_ptr.vmem [resolvable:$true] %s1637_s20 }
  0xa9   :  { %169 = vadd.xlane.f32.xlu0 %v168_v2  ;;  %1760 = vmatpush3.bf16.msra.mxu0 %v1927_v14  ;;  %v1653_v27 = vld [vmem:[%s2761_s1] ss:$0 sm:$0xff]  ;;  %v364_v2 = vrot.slane %v360_v53, %v2476_v42  ;;  %p2170_p9 = scmp.lt.s32.totalorder %s1638_s20, %s1638_s20 }
  0xaa   :  { %1761 = vmatprep.subr.bf16.mxu0 %v2209_v16  ;;  %1783 = vmatprep.subr.bf16.mxu1 %v2209_v16 }
  0xad   :  { %172 = vadd.xlane.f32.xlu0 %v171_v3  ;;  %1762 = vmatpush3.bf16.msra.mxu0 %v1929_v17 }
  0xae   :  { %1775 = vmatprep.subr.bf16.mxu0 %v2209_v16 }
 0x136   :  { %v170_v4 = vpop.xlane.xlu0 %169 }
 0x137   :  { %v175_v5 = vmul.f32 0.03125, %v170_v4 }
 0x139   :  { %v177_v6 = vsub.f32 %v2425_v0, %v175_v5 }
 0x13a   :  { %v173_v7 = vpop.xlane.xlu0 %172 }
 0x13b   :  { %v176_v8 = vmul.f32 0.03125, %v173_v7  ;;  %v179_v9 = vmul.f32 %v177_v6, %v177_v6 }
 0x13d   :  { %v178_v10 = vsub.f32 %v2430_v1, %v176_v8  ;;  %v181_v11 = vsel %vm167_vm0, %v179_v9, 0.0 }
 0x13e   :  { %182 = vadd.xlane.f32.xlu1 %v181_v11 }
 0x13f   :  { %v180_v12 = vmul.f32 %v178_v10, %v178_v10 }
 0x141   :  { %v184_v13 = vsel %vm167_vm0, %v180_v12, 0.0 }
 0x142   :  { %185 = vadd.xlane.f32.xlu1 %v184_v13 }
 0x1cb   :  { %v183_v19 = vpop.xlane.xlu1 %182 }
 0x1cc   :  { %v187_v20 = vmul.f32 0.03125, %v183_v19  ;;  %v427_v19 = vand.u32 127, %v218_v38 }
 0x1ce   :  { %v189_v21 = vadd.f32 1e-05, %v187_v20  ;;  %vm2513_vm4 = vcmp.le.s32.totalorder %v427_v19, %v219_v39 }
 0x1cf   :  { %v186_v22 = vpop.xlane.xlu1 %185 }
 0x1d0   :  { %1941 = vrsqrt.f32 %v189_v21  ;;  %v188_v23 = vmul.f32 0.03125, %v186_v22 }
 0x1d2   :  { %v190_v24 = vadd.f32 1e-05, %v188_v23 }
 0x1d4   :  { %1943 = vrsqrt.f32 %v190_v24 }
 0x1da   :  { %v1942_v25 = vpop.eup %1941 }
 0x1db   :  { %v193_v26 = vmul.f32 %v1942_v25, %v177_v6 }
 0x1dd   :  { %v201_v30 = vmul.f32 %v1653_v27, %v193_v26 }
 0x1de   :  { %v1944_v28 = vpop.eup %1943 }
 0x1df   :  { %v194_v29 = vmul.f32 %v1944_v28, %v178_v10  ;;  %v209_v33 = vadd.f32 %v1654_v31, %v201_v30 }
 0x1e1   :  { %v202_v32 = vmul.f32 %v1653_v27, %v194_v29 }
 0x1e3   :  { %v210_v34 = vadd.f32 %v1654_v31, %v202_v32 }
 0x1e5   :  { %v211_v36 = vpack.c.bf16 %v210_v34, %v209_v33 }
 0x1e7   :  { %1764 = vmatmul.mubr.msk.bf16.vlgmr.msra.gmra.mrb[0].mxu0 %vm167_vm0, %v211_v36  ;;  %1772 = vmatmul.mubr.msk.bf16.vlgmr.msra.gmra.mrb[0].mxu1 %vm167_vm0, %v211_v36 }
 0x1e8   :  { %1776 = vmatpush3.bf16.msra.mxu0 %v1931_v35  ;;  %1779 = vmatprep.mubr.msk.bf16.mxu0 %vm2210_vm1, %v2209_v16 }
 0x1e9   :  { %1777 = vmatprep.subr.bf16.mxu0 %v2209_v16  ;;  %1785 = vmatprep.mubr.msk.bf16.mxu1 %vm2210_vm1, %v2209_v16 }
 0x1ec   :  { %1778 = vmatpush3.bf16.msra.mxu0 %v1932_v37 }
 0x1ed   :  { %1789 = vmatprep.subr.bf16.mxu0 %v2209_v16 }
 0x1ef   :  { %1780 = vmatmul.mubr.msk.bf16.vlgmr.msra.gmra.mrb[4].mxu0 %vm167_vm0, %v211_v36 }
 0x1f0   :  { %1791 = vmatprep.mubr.msk.bf16.mxu0 %vm2210_vm1, %v2209_v16 }
 0x2ba   :  { %v271_v48 = vpop.f32.mrb[0].mxu0  ;;  %v342_v49 = vpop.f32.mrb[0].mxu1 }
 0x2bb   :  { %v343_v50 = vadd.f32 %v342_v49, %v295_v45  ;;  %v1765_v51 = vpop.f32.mrb[1].mxu0  ;;  %v1773_v52 = vpop.f32.mrb[1].mxu1  ;;  %v272_v56 = vadd.f32 %v271_v48, %v221_v47 }
 0x2bc   :  { %v274_v54 = vpop.f32.mrb[2].mxu0  ;;  %v345_v55 = vpop.f32.mrb[2].mxu1 }
 0x2bd   :  { %v2480_v57 = vpack.c.bf16 %v343_v50, %v343_v50  ;;  %v346_v58 = vadd.f32 %v345_v55, %v295_v45  ;;  %v1766_v59 = vpop.f32.mrb[3].mxu0  ;;  %v1774_v60 = vpop.f32.mrb[3].mxu1  ;;  %v275_v61 = vadd.f32 %v274_v54, %v221_v47  ;;  %v278_v3 = vmul.f32 0.35355338, %v272_v56 }
 0x2bf   :  { %v2482_v62 = vpack.c.bf16 %v346_v58, %v346_v58  ;;  %v434_v63 = vsel %vm429_vm2, %v2480_v57, 0  ;;  %v279_v6 = vmul.f32 0.35355338, %v275_v61  ;;  %v2491_v10 = vpack.c.bf16 %v278_v3, %v278_v3 }
 0x2c0   :  { %1784 = vmatpush3.bf16.xpose.msra.mxu1 %v434_v63 }
 0x2c1   :  { %v480_v4 = vsel %vm429_vm2, %v2482_v62, 0  ;;  %1795 = vmatprep.subr.bf16.mxu1 %v2209_v16  ;;  %v2495_v14 = vpack.c.bf16 %v279_v6, %v279_v6 }
 0x2c2   :  { %v411_v5 = vpop.f32.mrb[4].mxu0  ;;  %1790 = vmatpush3.bf16.xpose.msra.mxu0 %v480_v4 }
 0x2c3   :  { %v412_v7 = vadd.f32 %v411_v5, %v364_v2  ;;  %v1781_v8 = vpop.f32.mrb[5].mxu0  ;;  %1801 = vmatprep.subr.bf16.mxu0 %v2209_v16 }
 0x2c4   :  { %v414_v9 = vpop.f32.mrb[6].mxu0 }
 0x2c5   :  { %v2493_v11 = vpack.c.bf16 %v412_v7, %v412_v7  ;;  %v415_v12 = vadd.f32 %v414_v9, %v364_v2  ;;  %v1782_v13 = vpop.f32.mrb[7].mxu0 }
 0x2c7   :  { %v2497_v15 = vpack.c.bf16 %v415_v12, %v415_v12  ;;  %1786 = vmatmul.mubr.msk.bf16.vlgmr.msra.gmra.mrb[4].mxu1 %vm429_vm2, %v2491_v10  ;;  %v555_v17 = vsel %vm553_vm3, %v2493_v11, 0 }
 0x2c8   :  { %1796 = vmatpush3.bf16.msra.mxu1 %v555_v17  ;;  %1797 = vmatprep.mubr.msk.bf16.mxu1 %vm2210_vm1, %v2209_v16 }
 0x2c9   :  { %1792 = vmatmul.mubr.msk.bf16.vlgmr.msra.gmra.mrb[8].mxu0 %vm429_vm2, %v2495_v14  ;;  %v601_v18 = vsel %vm553_vm3, %v2497_v15, 0  ;;  %1807 = vmatprep.subr.bf16.mxu1 %v2209_v16 }
 0x2ca   :  { %1802 = vmatpush3.bf16.msra.mxu0 %v601_v18  ;;  %1803 = vmatprep.mubr.msk.bf16.mxu0 %vm2210_vm1, %v2209_v16 }
 0x2cb   :  { %1813 = vmatprep.subr.bf16.mxu0 %v2209_v16 }
 0x39a   :  { %v470_v21 = vpop.f32.mrb[4].mxu1 }
 0x39b   :  { %v524_v22 = vsel %vm2513_vm4, %v470_v21, -1e+30  ;;  %v1787_v23 = vpop.f32.mrb[5].mxu1 }
 0x39c   :  { %v473_v24 = vpop.f32.mrb[6].mxu1  ;;  %v516_v25 = vpop.f32.mrb[8].mxu0  ;;  %v526_v26 = vsel %vm429_vm2, %v524_v22, -inf }
 0x39d   :  { %v525_v27 = vsel %vm2513_vm4, %v516_v25, -1e+30  ;;  %527 = vmax.xlane.f32.xlu0 %v526_v26  ;;  %v1788_v28 = vpop.f32.mrb[7].mxu1  ;;  %v1793_v29 = vpop.f32.mrb[9].mxu0 }
 0x39e   :  { %v519_v30 = vpop.f32.mrb[10].mxu0  ;;  %v529_v31 = vsel %vm429_vm2, %v525_v27, -inf }
 0x39f   :  { %530 = vmax.xlane.f32.xlu1 %v529_v31  ;;  %v1794_v32 = vpop.f32.mrb[11].mxu0 }
 0x3b0   :  { %697 = vrot.lane.b32.xlu1 %v2482_v62, %s2211_s21 }
 0x42a   :  { %v528_v33 = vpop.xlane.xlu0 %527 }
 0x42b   :  { %v532_v34 = vsub.f32 %v524_v22, %v528_v33 }
 0x42c   :  { %v531_v35 = vpop.xlane.xlu1 %530 }
 0x42d   :  { %v534_v36 = vmul.f32 1.442695, %v532_v34  ;;  %v533_v37 = vsub.f32 %v525_v27, %v531_v35 }
 0x42f   :  { %1945 = vpow2.f32 %v534_v36  ;;  %v536_v38 = vmul.f32 1.442695, %v533_v37 }
 0x430   :  { %v698_v44 = vpop.permute.xlu1 %697 }
 0x431   :  { %1947 = vpow2.f32 %v536_v38  ;;  %v703_v55 = vsel %vm429_vm2, %v698_v44, 0 }
 0x439   :  { %v1946_v39 = vpop.eup %1945 }
 0x43a   :  { %v538_v40 = vsel %vm429_vm2, %v1946_v39, 0.0 }
 0x43b   :  { %v1948_v41 = vpop.eup %1947  ;;  %539 = vadd.xlane.f32.xlu0 %v538_v40 }
 0x43c   :  { %v541_v43 = vsel %vm429_vm2, %v1948_v41, 0.0 }
 0x43d   :  { %542 = vadd.xlane.f32.xlu1 %v541_v43 }
 0x44e   :  { %645 = vrot.lane.b32.xlu1 %v2491_v10, %s2211_s21 }
 0x451   :  { %647 = vrot.lane.b32.xlu0 %v2480_v57, %s2211_s21 }
 0x452   :  { %695 = vrot.lane.b32.xlu1 %v2495_v14, %s2211_s21 }
 0x4c8   :  { %v540_v45 = vpop.xlane.xlu0 %539 }
 0x4c9   :  { %1949 = vrcp.f32 %v540_v45 }
 0x4ca   :  { %v543_v46 = vpop.xlane.xlu1 %542 }
 0x4cb   :  { %1951 = vrcp.f32 %v543_v46 }
 0x4cc   :  { %v648_v50 = vpop.permute.xlu0 %647 }
 0x4cd   :  { %v653_v53 = vsel %vm429_vm2, %v648_v50, 0 }
 0x4ce   :  { %v646_v56 = vpop.permute.xlu1 %645 }
 0x4d2   :  { %v696_v58 = vpop.permute.xlu1 %695 }
 0x4d3   :  { %v1950_v47 = vpop.eup %1949 }
 0x4d4   :  { %v546_v48 = vmul.f32 %v1950_v47, %v1946_v39 }
 0x4d5   :  { %v1952_v49 = vpop.eup %1951 }
 0x4d6   :  { %v547_v51 = vmul.f32 %v1952_v49, %v1948_v41  ;;  %v548_v52 = vpack.c.bf16 %v546_v48, %v546_v48 }
 0x4d8   :  { %1798 = vmatmul.mubr.msk.bf16.vlgmr.msra.gmra.mrb[8].mxu1 %vm429_vm2, %v548_v52  ;;  %v549_v54 = vpack.c.bf16 %v547_v51, %v547_v51 }
 0x4d9   :  { %1808 = vmatpush3.bf16.xpose.msra.mxu1 %v653_v53  ;;  %1809 = vmatprep.mubr.msk.bf16.mxu1 %vm2210_vm1, %v2209_v16 }
 0x4da   :  { %1804 = vmatmul.mubr.msk.bf16.vlgmr.msra.gmra.mrb[12].mxu0 %vm429_vm2, %v549_v54  ;;  %1819 = vmatprep.subr.bf16.mxu1 %v2209_v16 }
 0x4db   :  { %1814 = vmatpush3.bf16.xpose.msra.mxu0 %v703_v55  ;;  %1815 = vmatprep.mubr.msk.bf16.mxu0 %vm2210_vm1, %v2209_v16 }
 0x4dc   :  { %1825 = vmatprep.subr.bf16.mxu0 %v2209_v16 }
 0x4e0   :  { %1810 = vmatmul.mubr.msk.bf16.vlgmr.msra.gmra.mrb[12].mxu1 %vm429_vm2, %v646_v56 }
 0x4e1   :  { %1821 = vmatprep.mubr.msk.bf16.mxu1 %vm2210_vm1, %v2209_v16 }
 0x4e2   :  { %1816 = vmatmul.mubr.msk.bf16.vlgmr.msra.gmra.mrb[16].mxu0 %vm429_vm2, %v696_v58 }
 0x4e3   :  { %1827 = vmatprep.mubr.msk.bf16.mxu0 %vm2210_vm1, %v2209_v16 }
 0x5ab   :  { %v591_v59 = vpop.f32.mrb[8].mxu1 }
 0x5ac   :  { %v1799_v60 = vpop.f32.mrb[9].mxu1 }
 0x5ad   :  { %v594_v61 = vpop.f32.mrb[10].mxu1  ;;  %v637_v63 = vpop.f32.mrb[12].mxu0 }
 0x5ae   :  { %v643_v2 = vpack.c.bf16 %v637_v63, %v591_v59  ;;  %v1800_v3 = vpop.f32.mrb[11].mxu1  ;;  %v1805_v4 = vpop.f32.mrb[13].mxu0 }
 0x5af   :  { %v640_v5 = vpop.f32.mrb[14].mxu0 }
 0x5b0   :  { %644 = vst.msk [vmem:[#allocation2] sm:$0xff] %vm429_vm2, %v643_v2  ;;  %v1806_v6 = vpop.f32.mrb[15].mxu0 }
 0x5b3   :  { %v689_v7 = vpop.f32.mrb[12].mxu1 }
 0x5b4   :  { %v745_v8 = vsel %vm2513_vm4, %v689_v7, -1e+30  ;;  %v1811_v9 = vpop.f32.mrb[13].mxu1 }
 0x5b5   :  { %v692_v12 = vpop.f32.mrb[14].mxu1  ;;  %v739_v13 = vpop.f32.mrb[16].mxu0  ;;  %v747_v17 = vsel %vm429_vm2, %v745_v8, -inf }
 0x5b6   :  { %v746_v18 = vsel %vm2513_vm4, %v739_v13, -1e+30  ;;  %748 = vmax.xlane.f32.xlu0 %v747_v17  ;;  %v1812_v19 = vpop.f32.mrb[15].mxu1  ;;  %v1817_v21 = vpop.f32.mrb[17].mxu0 }
 0x5b7   :  { %v742_v22 = vpop.f32.mrb[18].mxu0  ;;  %v750_v23 = vsel %vm429_vm2, %v746_v18, -inf }
 0x5b8   :  { %751 = vmax.xlane.f32.xlu1 %v750_v23  ;;  %v1818_v24 = vpop.f32.mrb[19].mxu0 }
 0x5c9   :  { %819 = vrot.lane.b32.xlu1 %v2497_v15, %s2211_s21 }
 0x5cd   :  { %876 = vrot.lane.b32.xlu1 %v2480_v57, %s2212_s18 }
 0x5d1   :  { %926 = vrot.lane.b32.xlu1 %v2482_v62, %s2212_s18 }
 0x5d5   :  { %924 = vrot.lane.b32.xlu1 %v2495_v14, %s2212_s18 }
 0x643   :  { %v749_v25 = vpop.xlane.xlu0 %748 }
 0x644   :  { %v753_v26 = vsub.f32 %v745_v8, %v749_v25 }
 0x645   :  { %v752_v27 = vpop.xlane.xlu1 %751 }
 0x646   :  { %v755_v28 = vmul.f32 1.442695, %v753_v26  ;;  %v754_v29 = vsub.f32 %v746_v18, %v752_v27 }
 0x648   :  { %1953 = vpow2.f32 %v755_v28  ;;  %v757_v30 = vmul.f32 1.442695, %v754_v29 }
 0x649   :  { %v820_v31 = vpop.permute.xlu1 %819 }
 0x64a   :  { %1955 = vpow2.f32 %v757_v30  ;;  %v825_v32 = vsel %vm553_vm3, %v820_v31, 0 }
 0x64b   :  { %1826 = vmatpush3.bf16.msra.mxu0 %v825_v32 }
 0x64c   :  { %1837 = vmatprep.subr.bf16.mxu0 %v2209_v16 }
 0x64d   :  { %v877_v43 = vpop.permute.xlu1 %876 }
 0x64e   :  { %v882_v49 = vsel %vm429_vm2, %v877_v43, 0 }
 0x651   :  { %v927_v48 = vpop.permute.xlu1 %926 }
 0x652   :  { %v1954_v33 = vpop.eup %1953  ;;  %v932_v51 = vsel %vm429_vm2, %v927_v48, 0 }
 0x653   :  { %v759_v34 = vsel %vm429_vm2, %v1954_v33, 0.0 }
 0x654   :  { %v1956_v35 = vpop.eup %1955  ;;  %760 = vadd.xlane.f32.xlu0 %v759_v34 }
 0x655   :  { %v762_v36 = vsel %vm429_vm2, %v1956_v35, 0.0  ;;  %v925_v53 = vpop.permute.xlu1 %924 }
 0x658   :  { %763 = vadd.xlane.f32.xlu0 %v762_v36 }
 0x66e   :  { %771 = vrot.lane.b32.xlu0 %v2493_v11, %s2211_s21 }
 0x672   :  { %874 = vrot.lane.b32.xlu0 %v2491_v10, %s2212_s18 }
 0x6e1   :  { %v761_v37 = vpop.xlane.xlu0 %760 }
 0x6e2   :  { %1957 = vrcp.f32 %v761_v37 }
 0x6e5   :  { %v764_v38 = vpop.xlane.xlu0 %763 }
 0x6e6   :  { %1959 = vrcp.f32 %v764_v38 }
 0x6e9   :  { %v772_v39 = vpop.permute.xlu0 %771 }
 0x6ea   :  { %v777_v40 = vsel %vm553_vm3, %v772_v39, 0 }
 0x6eb   :  { %1820 = vmatpush3.bf16.msra.mxu1 %v777_v40 }
 0x6ec   :  { %v1958_v41 = vpop.eup %1957  ;;  %1831 = vmatprep.subr.bf16.mxu1 %v2209_v16 }
 0x6ed   :  { %v767_v44 = vmul.f32 %v1958_v41, %v1954_v33  ;;  %v875_v52 = vpop.permute.xlu0 %874 }
 0x6ef   :  { %v769_v45 = vpack.c.bf16 %v767_v44, %v767_v44 }
 0x6f0   :  { %v1960_v46 = vpop.eup %1959 }
 0x6f1   :  { %v768_v47 = vmul.f32 %v1960_v46, %v1956_v35  ;;  %1822 = vmatmul.mubr.msk.bf16.vlgmr.msra.gmra.mrb[16].mxu1 %vm429_vm2, %v769_v45 }
 0x6f2   :  { %1833 = vmatprep.mubr.msk.bf16.mxu1 %vm2210_vm1, %v2209_v16 }
 0x6f3   :  { %v770_v50 = vpack.c.bf16 %v768_v47, %v768_v47 }
 0x6f4   :  { %1832 = vmatpush3.bf16.xpose.msra.mxu1 %v882_v49 }
 0x6f5   :  { %1828 = vmatmul.mubr.msk.bf16.vlgmr.msra.gmra.mrb[20].mxu0 %vm429_vm2, %v770_v50  ;;  %1843 = vmatprep.subr.bf16.mxu1 %v2209_v16 }
 0x6f6   :  { %1838 = vmatpush3.bf16.xpose.msra.mxu0 %v932_v51  ;;  %1839 = vmatprep.mubr.msk.bf16.mxu0 %vm2210_vm1, %v2209_v16 }
 0x6f7   :  { %1849 = vmatprep.subr.bf16.mxu0 %v2209_v16 }
 0x6fb   :  { %1834 = vmatmul.mubr.msk.bf16.vlgmr.msra.gmra.mrb[20].mxu1 %vm429_vm2, %v875_v52 }
 0x6fc   :  { %1845 = vmatprep.mubr.msk.bf16.mxu1 %vm2210_vm1, %v2209_v16 }
 0x6fd   :  { %1840 = vmatmul.mubr.msk.bf16.vlgmr.msra.gmra.mrb[24].mxu0 %vm429_vm2, %v925_v53 }
 0x6fe   :  { %1851 = vmatprep.mubr.msk.bf16.mxu0 %vm2210_vm1, %v2209_v16 }
 0x7c4   :  { %v2590_v54 = vpop.f32.mrb[16].mxu1 }
 0x7c5   :  { %v1823_v55 = vpop.f32.mrb[17].mxu1 }
 0x7c6   :  { %v816_v56 = vpop.f32.mrb[18].mxu1 }
 0x7c7   :  { %v1824_v58 = vpop.f32.mrb[19].mxu1 }
 0x7c8   :  { %v2592_v59 = vpop.f32.mrb[20].mxu0 }
 0x7c9   :  { %v867_v60 = vpack.c.bf16 %v2592_v59, %v2590_v54  ;;  %v1829_v61 = vpop.f32.mrb[21].mxu0 }
 0x7ca   :  { %v864_v63 = vpop.f32.mrb[22].mxu0 }
 0x7cb   :  { %v1830_v2 = vpop.f32.mrb[23].mxu0 }
 0x7ce   :  { %v918_v3 = vpop.f32.mrb[20].mxu1 }
 0x7cf   :  { %v974_v4 = vsel %vm2513_vm4, %v918_v3, -1e+30  ;;  %v1835_v5 = vpop.f32.mrb[21].mxu1 }
 0x7d0   :  { %v921_v6 = vpop.f32.mrb[22].mxu1  ;;  %v968_v7 = vpop.f32.mrb[24].mxu0  ;;  %v976_v8 = vsel %vm429_vm2, %v974_v4, -inf }
 0x7d1   :  { %v975_v9 = vsel %vm2513_vm4, %v968_v7, -1e+30  ;;  %977 = vmax.xlane.f32.xlu0 %v976_v8  ;;  %v1836_v12 = vpop.f32.mrb[23].mxu1  ;;  %v1841_v13 = vpop.f32.mrb[25].mxu0 }
 0x7d2   :  { %v971_v17 = vpop.f32.mrb[26].mxu0  ;;  %v979_v18 = vsel %vm429_vm2, %v975_v9, -inf }
 0x7d3   :  { %980 = vmax.xlane.f32.xlu1 %v979_v18  ;;  %v1842_v19 = vpop.f32.mrb[27].mxu0 }
 0x7e4   :  { %1048 = vrot.lane.b32.xlu1 %v2497_v15, %s2212_s18 }
 0x7e8   :  { %1105 = vrot.lane.b32.xlu1 %v2480_v57, %s2213_s6 }
 0x7ec   :  { %1155 = vrot.lane.b32.xlu1 %v2482_v62, %s2213_s6 }
 0x7f0   :  { %1153 = vrot.lane.b32.xlu1 %v2495_v14, %s2213_s6 }
 0x85e   :  { %v978_v21 = vpop.xlane.xlu0 %977 }
 0x85f   :  { %v982_v22 = vsub.f32 %v974_v4, %v978_v21 }
 0x860   :  { %v981_v23 = vpop.xlane.xlu1 %980 }
 0x861   :  { %v984_v24 = vmul.f32 1.442695, %v982_v22  ;;  %v983_v25 = vsub.f32 %v975_v9, %v981_v23 }
 0x863   :  { %1961 = vpow2.f32 %v984_v24  ;;  %v986_v26 = vmul.f32 1.442695, %v983_v25 }
 0x864   :  { %v1049_v27 = vpop.permute.xlu1 %1048 }
 0x865   :  { %1963 = vpow2.f32 %v986_v26  ;;  %v1054_v28 = vsel %vm553_vm3, %v1049_v27, 0 }
 0x866   :  { %1850 = vmatpush3.bf16.msra.mxu0 %v1054_v28 }
 0x867   :  { %1861 = vmatprep.subr.bf16.mxu0 %v2209_v16 }
 0x868   :  { %v1106_v35 = vpop.permute.xlu1 %1105 }
 0x86c   :  { %v1156_v40 = vpop.permute.xlu1 %1155 }
 0x86d   :  { %v1962_v57 = vpop.eup %1961  ;;  %v1161_v43 = vsel %vm429_vm2, %v1156_v40, 0 }
 0x86e   :  { %v988_v62 = vsel %vm429_vm2, %v1962_v57, 0.0 }
 0x86f   :  { %v1964_v29 = vpop.eup %1963  ;;  %989 = vadd.xlane.f32.xlu0 %v988_v62 }
 0x870   :  { %v991_v14 = vsel %vm429_vm2, %v1964_v29, 0.0  ;;  %v1154_v45 = vpop.permute.xlu1 %1153 }
 0x873   :  { %992 = vadd.xlane.f32.xlu0 %v991_v14 }
 0x889   :  { %1000 = vrot.lane.b32.xlu0 %v2493_v11, %s2212_s18 }
 0x88d   :  { %1103 = vrot.lane.b32.xlu0 %v2491_v10, %s2213_s6  ;;  %v1111_v10 = vsel %vm429_vm2, %v1106_v35, 0 }
 0x8fc   :  { %v990_v30 = vpop.xlane.xlu0 %989 }
 0x8fd   :  { %1965 = vrcp.f32 %v990_v30 }
 0x900   :  { %v993_v31 = vpop.xlane.xlu0 %992 }
 0x901   :  { %1967 = vrcp.f32 %v993_v31  ;;  %v1933_v31 = vld [vmem:[%s2740_s9] sm:$0xff]  }
 0x904   :  { %v1001_v32 = vpop.permute.xlu0 %1000 }
 0x905   :  { %v1006_v33 = vsel %vm553_vm3, %v1001_v32, 0  ;;  %v1934_v32 = vld [vmem:[%s2740_s9 + $0x8] sm:$0xff]  }
 0x906   :  { %1844 = vmatpush3.bf16.msra.mxu1 %v1006_v33 }
 0x907   :  { %v1966_v34 = vpop.eup %1965  ;;  %1855 = vmatprep.subr.bf16.mxu1 %v2209_v16 }
 0x908   :  { %v996_v36 = vmul.f32 %v1966_v34, %v1962_v57  ;;  %v1104_v44 = vpop.permute.xlu0 %1103 }
 0x90a   :  { %v998_v37 = vpack.c.bf16 %v996_v36, %v996_v36 }
 0x90b   :  { %v1968_v38 = vpop.eup %1967 }
 0x90c   :  { %v997_v39 = vmul.f32 %v1968_v38, %v1964_v29  ;;  %1846 = vmatmul.mubr.msk.bf16.vlgmr.msra.gmra.mrb[24].mxu1 %vm429_vm2, %v998_v37 }
 0x90d   :  { %1857 = vmatprep.mubr.msk.bf16.mxu1 %vm2210_vm1, %v2209_v16 }
 0x90e   :  { %v999_v41 = vpack.c.bf16 %v997_v39, %v997_v39 }
 0x90f   :  { %1856 = vmatpush3.bf16.xpose.msra.mxu1 %v1111_v10 }
 0x910   :  { %1852 = vmatmul.mubr.msk.bf16.vlgmr.msra.gmra.mrb[28].mxu0 %vm429_vm2, %v999_v41  ;;  %1867 = vmatprep.subr.bf16.mxu1 %v2209_v16 }
 0x911   :  { %1862 = vmatpush3.bf16.xpose.msra.mxu0 %v1161_v43  ;;  %1863 = vmatprep.mubr.msk.bf16.mxu0 %vm2210_vm1, %v2209_v16 }
 0x912   :  { %1873 = vmatprep.subr.bf16.mxu0 %v2209_v16 }
 0x916   :  { %1858 = vmatmul.mubr.msk.bf16.vlgmr.msra.gmra.mrb[28].mxu1 %vm429_vm2, %v1104_v44  ;;  %v1337_v44 = vld [vmem:[#allocation13] sm:$0x1] }
 0x917   :  { %1869 = vmatprep.mubr.msk.bf16.mxu1 %vm2210_vm1, %v2209_v16 }
 0x918   :  { %1864 = vmatmul.mubr.msk.bf16.vlgmr.msra.gmra.mrb[32].mxu0 %vm429_vm2, %v1154_v45  ;;  %v1338_v45 = vunpack.c.l.bf16 %v1337_v44 }
 0x919   :  { %1875 = vmatprep.mubr.msk.bf16.mxu0 %vm2210_vm1, %v2209_v16 }
 0x9df   :  { %v1042_v46 = vpop.f32.mrb[24].mxu1 }
 0x9e0   :  { %v1847_v47 = vpop.f32.mrb[25].mxu1 }
 0x9e1   :  { %v1045_v48 = vpop.f32.mrb[26].mxu1 }
 0x9e2   :  { %v1848_v49 = vpop.f32.mrb[27].mxu1 }
 0x9e3   :  { %v1090_v50 = vpop.f32.mrb[28].mxu0 }
 0x9e4   :  { %v1096_v51 = vpack.c.bf16 %v1090_v50, %v1042_v46  ;;  %v1853_v52 = vpop.f32.mrb[29].mxu0  ;;  %v1342_v46 = vrot.slane %v1338_v45, %v2476_v42 }
 0x9e5   :  { %v1093_v53 = vpop.f32.mrb[30].mxu0 }
 0x9e6   :  { %v1854_v55 = vpop.f32.mrb[31].mxu0 }
 0x9e9   :  { %v1147_v56 = vpop.f32.mrb[28].mxu1 }
 0x9ea   :  { %v1203_v58 = vsel %vm2513_vm4, %v1147_v56, -1e+30  ;;  %v1859_v61 = vpop.f32.mrb[29].mxu1 }
 0x9eb   :  { %v1150_v63 = vpop.f32.mrb[30].mxu1  ;;  %v1197_v2 = vpop.f32.mrb[32].mxu0  ;;  %v1205_v3 = vsel %vm429_vm2, %v1203_v58, -inf }
 0x9ec   :  { %v1204_v4 = vsel %vm2513_vm4, %v1197_v2, -1e+30  ;;  %1206 = vmax.xlane.f32.xlu0 %v1205_v3  ;;  %v1860_v5 = vpop.f32.mrb[31].mxu1  ;;  %v1865_v6 = vpop.f32.mrb[33].mxu0 }
 0x9ed   :  { %v1200_v7 = vpop.f32.mrb[34].mxu0  ;;  %v1208_v8 = vsel %vm429_vm2, %v1204_v4, -inf }
 0x9ee   :  { %1209 = vmax.xlane.f32.xlu1 %v1208_v8  ;;  %v1866_v9 = vpop.f32.mrb[35].mxu0  ;;  %v1935_v8 = vld [vmem:[%s2744_s13] sm:$0xff]  }
 0x9ef   :  { %v1936_v9 = vld [vmem:[%s2744_s13 + $0x8] sm:$0xff]  }
 0x9ff   :  { %1277 = vrot.lane.b32.xlu1 %v2497_v15, %s2213_s6 }
 0xa03   :  { %869 = vrot.lane.b32.xlu1 %v867_v60, %s2214_s17 }
 0xa07   :  { %1098 = vrot.lane.b32.xlu1 %v1096_v51, %s2215_s22 }
 0xa79   :  { %v1207_v20 = vpop.xlane.xlu0 %1206 }
 0xa7a   :  { %v1211_v12 = vsub.f32 %v1203_v58, %v1207_v20 }
 0xa7b   :  { %v1210_v13 = vpop.xlane.xlu1 %1209 }
 0xa7c   :  { %v1213_v17 = vmul.f32 1.442695, %v1211_v12  ;;  %v1212_v18 = vsub.f32 %v1204_v4, %v1210_v13 }
 0xa7e   :  { %1969 = vpow2.f32 %v1213_v17  ;;  %v1215_v19 = vmul.f32 1.442695, %v1212_v18 }
 0xa7f   :  { %v1278_v21 = vpop.permute.xlu1 %1277 }
 0xa80   :  { %1971 = vpow2.f32 %v1215_v19  ;;  %v1283_v22 = vsel %vm553_vm3, %v1278_v21, 0 }
 0xa81   :  { %1874 = vmatpush3.bf16.msra.mxu0 %v1283_v22 }
 0xa82   :  { %1887 = vmatprep.subr.bf16.mxu0 %v2209_v16 }
 0xa83   :  { %v870_v15 = vpop.permute.xlu1 %869 }
 0xa84   :  { %873 = vst.msk [vmem:[#allocation2] sm:$0xff] %vm872_vm5, %v870_v15  ;;  %v1689_v15 = vld [vmem:[#allocation15] ss:$0 sm:$0xff] }
 0xa87   :  { %v1099_v54 = vpop.permute.xlu1 %1098 }
 0xa88   :  { %v1970_v59 = vpop.eup %1969  ;;  %1102 = vst.msk [vmem:[#allocation2] sm:$0xff] %vm1101_vm6, %v1099_v54 }
 0xa89   :  { %v1217_v60 = vsel %vm429_vm2, %v1970_v59, 0.0 }
 0xa8a   :  { %v1972_v23 = vpop.eup %1971  ;;  %1218 = vadd.xlane.f32.xlu0 %v1217_v60 }
 0xa8b   :  { %v1220_v24 = vsel %vm429_vm2, %v1972_v23, 0.0 }
 0xa8e   :  { %1221 = vadd.xlane.f32.xlu0 %v1220_v24 }
 0xaa4   :  { %1229 = vrot.lane.b32.xlu0 %v2493_v11, %s2213_s6 }
 0xb17   :  { %v1219_v25 = vpop.xlane.xlu0 %1218 }
 0xb18   :  { %1973 = vrcp.f32 %v1219_v25 }
 0xb1b   :  { %v1222_v26 = vpop.xlane.xlu0 %1221 }
 0xb1c   :  { %1975 = vrcp.f32 %v1222_v26 }
 0xb1f   :  { %v1230_v27 = vpop.permute.xlu0 %1229 }
 0xb20   :  { %v1235_v28 = vsel %vm553_vm3, %v1230_v27, 0 }
 0xb21   :  { %1868 = vmatpush3.bf16.msra.mxu1 %v1235_v28 }
 0xb22   :  { %v1974_v57 = vpop.eup %1973  ;;  %1879 = vmatprep.subr.bf16.mxu1 %v2209_v16 }
 0xb23   :  { %v1225_v62 = vmul.f32 %v1974_v57, %v1970_v59  ;;  %v1937_v57 = vld [vmem:[%s2746_s15] sm:$0xff]  }
 0xb25   :  { %v1227_v29 = vpack.c.bf16 %v1225_v62, %v1225_v62  ;;  %v1938_v62 = vld [vmem:[%s2746_s15 + $0x8] sm:$0xff]  }
 0xb26   :  { %v1976_v14 = vpop.eup %1975 }
 0xb27   :  { %v1226_v30 = vmul.f32 %v1976_v14, %v1972_v23  ;;  %1870 = vmatmul.mubr.msk.bf16.vlgmr.msra.gmra.mrb[32].mxu1 %vm429_vm2, %v1227_v29  ;;  %v1690_v23 = vld [vmem:[#allocation16] ss:$0 sm:$0xff]  ;;  %v1940_v14 = vld [vmem:[%s2746_s15 + $0x18] sm:$0xff]  }
 0xb28   :  { %1883 = vmatprep.mubr.msk.bf16.mxu1 %vm2210_vm1, %v2209_v16  ;;  %1880 = vmatpush3.bf16.msra.mxu1 %v1933_v31  ;;  %v1939_v29 = vld [vmem:[%s2746_s15 + $0x10] sm:$0xff]  }
 0xb29   :  { %v1228_v11 = vpack.c.bf16 %v1226_v30, %v1226_v30  ;;  %1881 = vmatprep.subr.bf16.mxu1 %v2209_v16  ;;  %v1454_v30 = vld [vmem:[%s2745_s14] sm:$0x1] }
 0xb2b   :  { %1876 = vmatmul.mubr.msk.bf16.vlgmr.msra.gmra.mrb[36].mxu0 %vm429_vm2, %v1228_v11  ;;  %v1455_v11 = vunpack.c.l.bf16 %v1454_v30 }
 0xb2c   :  { %1891 = vmatprep.mubr.msk.bf16.mxu0 %vm2210_vm1, %v2209_v16  ;;  %1882 = vmatpush3.bf16.msra.mxu1 %v1934_v32 }
 0xb2d   :  { %1895 = vmatprep.subr.bf16.mxu1 %v2209_v16  ;;  %1888 = vmatpush3.bf16.msra.mxu0 %v1935_v8  ;;  %v1459_v31 = vrot.slane %v1455_v11, %v2476_v42 }
 0xb2e   :  { %1889 = vmatprep.subr.bf16.mxu0 %v2209_v16 }
 0xb31   :  { %1890 = vmatpush3.bf16.msra.mxu0 %v1936_v9 }
 0xbfa   :  { %v1271_v33 = vpop.f32.mrb[32].mxu1 }
 0xbfb   :  { %v1871_v34 = vpop.f32.mrb[33].mxu1 }
 0xbfc   :  { %v1274_v35 = vpop.f32.mrb[34].mxu1 }
 0xbfd   :  { %v1872_v36 = vpop.f32.mrb[35].mxu1 }
 0xbfe   :  { %v1319_v37 = vpop.f32.mrb[36].mxu0 }
 0xbff   :  { %v1325_v38 = vpack.c.bf16 %v1319_v37, %v1271_v33  ;;  %v1877_v39 = vpop.f32.mrb[37].mxu0 }
 0xc00   :  { %v1322_v40 = vpop.f32.mrb[38].mxu0 }
 0xc01   :  { %1327 = vrot.lane.b32.xlu0 %v1325_v38, %s2216_s26  ;;  %v1878_v10 = vpop.f32.mrb[39].mxu0 }
 0xc73   :  { %v1328_v41 = vpop.permute.xlu0 %1327 }
 0xc74   :  { %1331 = vst.msk [vmem:[#allocation2] sm:$0xff] %vm1330_vm7, %v1328_v41 }
 0xc7b   :  { %v1332_v43 = vld [vmem:[#allocation2] sm:$0xff] }
 0xc7c   :  { %1884 = vmatmul.mubr.msk.bf16.vlgmr.msra.gmra.mrb[36].mxu1 %vm167_vm0, %v1332_v43 }
 0xc7d   :  { %1903 = vmatprep.mubr.msk.bf16.mxu1 %vm2210_vm1, %v2209_v16  ;;  %1896 = vmatpush3.bf16.msra.mxu1 %v1937_v57 }
 0xc7e   :  { %1897 = vmatprep.subr.bf16.mxu1 %v2209_v16 }
 0xc81   :  { %1898 = vmatpush3.bf16.msra.mxu1 %v1938_v62 }
 0xc82   :  { %1899 = vmatprep.subr.bf16.mxu1 %v2209_v16 }
 0xc85   :  { %1900 = vmatpush3.bf16.msra.mxu1 %v1939_v29 }
 0xc86   :  { %1901 = vmatprep.subr.bf16.mxu1 %v2209_v16 }
 0xc89   :  { %1902 = vmatpush3.bf16.msra.mxu1 %v1940_v14 }
 0xd4f   :  { %v1392_v47 = vpop.f32.mrb[36].mxu1 }
 0xd50   :  { %v1393_v48 = vadd.f32 %v1392_v47, %v1342_v46  ;;  %v1885_v49 = vpop.f32.mrb[37].mxu1 }
 0xd51   :  { %v1395_v50 = vpop.f32.mrb[38].mxu1 }
 0xd52   :  { %v1399_v51 = vadd.f32 %v1393_v48, %v2425_v0  ;;  %v1396_v52 = vadd.f32 %v1395_v50, %v1342_v46  ;;  %v1886_v53 = vpop.f32.mrb[39].mxu1 }
 0xd54   :  { %1401 = vst.msk [vmem:[#allocation3] sm:$0xff] %vm167_vm0, %v1399_v51  ;;  %v1400_v55 = vadd.f32 %v1396_v52, %v2430_v1  ;;  %v1405_v56 = vsel %vm167_vm0, %v1399_v51, 0.0  ;;  %v1622_v52 = vld [vmem:[%s2747_s16] sm:$0x1]  ;;  %s2165_s16 = scalar_lea.vmem %s1638_s20, 256 }
 0xd55   :  { %1406 = vadd.xlane.f32.xlu1 %v1405_v56  ;;  %p2166_p8 = scmp.ne.s32.totalorder %s1638_s20, %s2165_s16  ;;  %p2171_p10 = scmp.lt.s32.totalorder %s2165_s16, %s2165_s16 }
 0xd56   :  { %1402 = vst.msk [vmem:[#allocation3 + $0x8] sm:$0xff] %vm167_vm0, %v1400_v55  ;;  %v1408_v58 = vsel %vm167_vm0, %v1400_v55, 0.0 }
 0xd57   :  { %1409 = vadd.xlane.f32.xlu0 %v1408_v58  ;;  %p2172_p11 = por %p2171_p10, %p2170_p9 }
 0xd59   :  { %p2173_p12 = pnand %p2172_p11, %p2166_p8 }
 0xd5b   :  { %v1533_v50 = vld [vmem:[#allocation3] sm:$0xff] }
 0xd5d   :  { %v1534_v56 = vld [vmem:[#allocation3 + $0x8] sm:$0xff] }
 0xde2   :  { %v1407_v61 = vpop.xlane.xlu1 %1406 }
 0xde3   :  { %v1411_v63 = vmul.f32 0.03125, %v1407_v61 }
 0xde4   :  { %v1410_v2 = vpop.xlane.xlu0 %1409 }
 0xde5   :  { %v1413_v3 = vsub.f32 %v1399_v51, %v1411_v63  ;;  %v1412_v4 = vmul.f32 0.03125, %v1410_v2  ;;  %v1623_v2 = vunpack.c.l.bf16 %v1622_v52 }
 0xde7   :  { %v1414_v0 = vsub.f32 %v1400_v55, %v1412_v4  ;;  %v1415_v5 = vmul.f32 %v1413_v3, %v1413_v3 }
 0xde9   :  { %v1417_v6 = vsel %vm167_vm0, %v1415_v5, 0.0  ;;  %v1416_v7 = vmul.f32 %v1414_v0, %v1414_v0 }
 0xdea   :  { %1418 = vadd.xlane.f32.xlu0 %v1417_v6 }
 0xdeb   :  { %v1420_v1 = vsel %vm167_vm0, %v1416_v7, 0.0 }
 0xdee   :  { %1421 = vadd.xlane.f32.xlu0 %v1420_v1 }
 0xe77   :  { %v1419_v20 = vpop.xlane.xlu0 %1418 }
 0xe78   :  { %v1423_v12 = vmul.f32 0.03125, %v1419_v20 }
 0xe7a   :  { %v1425_v13 = vadd.f32 1e-05, %v1423_v12 }
 0xe7b   :  { %v1422_v17 = vpop.xlane.xlu0 %1421 }
 0xe7c   :  { %1977 = vrsqrt.f32 %v1425_v13  ;;  %v1424_v18 = vmul.f32 0.03125, %v1422_v17 }
 0xe7e   :  { %v1426_v19 = vadd.f32 1e-05, %v1424_v18 }
 0xe80   :  { %1979 = vrsqrt.f32 %v1426_v19 }
 0xe86   :  { %v1978_v21 = vpop.eup %1977 }
 0xe87   :  { %v1429_v22 = vmul.f32 %v1978_v21, %v1413_v3  ;;  %v1627_v3 = vrot.slane %v1623_v2, %v2476_v42 }
 0xe89   :  { %v1437_v59 = vmul.f32 %v1689_v15, %v1429_v22 }
 0xe8a   :  { %v1980_v54 = vpop.eup %1979 }
 0xe8b   :  { %v1430_v60 = vmul.f32 %v1980_v54, %v1414_v0  ;;  %v1445_v25 = vadd.f32 %v1690_v23, %v1437_v59 }
 0xe8d   :  { %v1438_v24 = vmul.f32 %v1689_v15, %v1430_v60 }
 0xe8f   :  { %v1446_v26 = vadd.f32 %v1690_v23, %v1438_v24 }
 0xe91   :  { %v1447_v27 = vpack.c.bf16 %v1446_v26, %v1445_v25 }
 0xe93   :  { %1448 = vst.msk [vmem:[#allocation2] sm:$0xff] %vm167_vm0, %v1447_v27 }
 0xe9a   :  { %v1449_v28 = vld [vmem:[#allocation2] sm:$0xff] }
 0xe9b   :  { %1892 = vmatmul.mubr.msk.bf16.vlgmr.msra.gmra.mrb[40].mxu0 %vm167_vm0, %v1449_v28 }
 0xf6e   :  { %v1510_v32 = vpop.f32.mrb[40].mxu0 }
 0xf6f   :  { %v1511_v33 = vadd.f32 %v1510_v32, %v1459_v31  ;;  %v1893_v34 = vpop.f32.mrb[41].mxu0 }
 0xf70   :  { %v1513_v35 = vpop.f32.mrb[42].mxu0 }
 0xf71   :  { %v1694_v36 = vmul.f32 -1.702, %v1511_v33  ;;  %v1514_v37 = vadd.f32 %v1513_v35, %v1459_v31  ;;  %v1894_v38 = vpop.f32.mrb[43].mxu0 }
 0xf73   :  { %v1521_v16 = vmul.f32 1.442695, %v1694_v36  ;;  %v1695_v39 = vmul.f32 -1.702, %v1514_v37 }
 0xf75   :  { %1981 = vpow2.f32 %v1521_v16  ;;  %v1523_v40 = vmul.f32 1.442695, %v1695_v39 }
 0xf77   :  { %1983 = vpow2.f32 %v1523_v40 }
 0xf7f   :  { %v1982_v10 = vpop.eup %1981 }
 0xf80   :  { %v1525_v41 = vadd.f32 1.0, %v1982_v10 }
 0xf81   :  { %v1984_v43 = vpop.eup %1983 }
 0xf82   :  { %1985 = vrcp.f32 %v1525_v41  ;;  %v1526_v44 = vadd.f32 1.0, %v1984_v43 }
 0xf84   :  { %1987 = vrcp.f32 %v1526_v44 }
 0xf8c   :  { %v1986_v45 = vpop.eup %1985 }
 0xf8d   :  { %v1531_v47 = vmul.f32 %v1986_v45, %v1511_v33 }
 0xf8e   :  { %v1988_v46 = vpop.eup %1987 }
 0xf8f   :  { %v1532_v48 = vmul.f32 %v1988_v46, %v1514_v37 }
 0xf91   :  { %v1535_v49 = vpack.c.bf16 %v1532_v48, %v1531_v47 }
 0xf93   :  { %1904 = vmatmul.mubr.msk.bf16.vlgmr.msra.gmra.mrb[40].mxu1 %vm1568_vm8, %v1535_v49 }
0x1066   :  { %v1606_v51 = vpop.f32.mrb[40].mxu1 }
0x1067   :  { %v1613_v53 = vadd.f32 %v1606_v51, %v1533_v50  ;;  %v1905_v55 = vpop.f32.mrb[41].mxu1 }
0x1068   :  { %v1609_v58 = vpop.f32.mrb[42].mxu1 }
0x1069   :  { %1615 = vst.msk [vmem:[#allocation3] sm:$0xff] %vm167_vm0, %v1613_v53  ;;  %v1614_v61 = vadd.f32 %v1609_v58, %v1534_v56  ;;  %v1906_v63 = vpop.f32.mrb[43].mxu1 }
0x106b   :  { %1616 = vst.msk [vmem:[#allocation3 + $0x8] sm:$0xff] %vm167_vm0, %v1614_v61 }
0x1070   :  { %v1620_v4 = vld [vmem:[#allocation3] sm:$0xff] }
0x1071   :  { %v1628_v0 = vadd.f32 %v1627_v3, %v1620_v4 }
0x1072   :  { %v1621_v5 = vld [vmem:[#allocation3 + $0x8] sm:$0xff] }
0x1073   :  { %v1629_v6 = vadd.f32 %v1627_v3, %v1621_v5  ;;  %1630 = vst.msk [vmem:[#allocation18] sm:$0xff] %vm167_vm0, %v1628_v0 }
0x1075   :  { %1631 = vst.msk [vmem:[#allocation18 + $0x8] sm:$0xff] %vm167_vm0, %v1629_v6 }
0x1076   :  { %2176 = shalt.err (!%p2173_p12)
}
0x1077   :  { %s2177_s18 = scalar_lea.hbm %s2750_s19, 256 }
0x1078   :  { %p2178_p13 = scmp.ne.s32.totalorder %s2750_s19, %s2177_s18  ;;  %p2181_p0 = scmp.lt.u32.totalorder %s2177_s18, %s2750_s19 }
0x107a   :  { %p2183_p1 = pnand %p2181_p0, %p2178_p13 }
0x107c   :  { %2186 = shalt.err (!%p2183_p1)
}
0x107d   :  { %s2218_s4 = smov 128  }
0x107e   :  { %1643 = dma.vmem_to_hbm [thread:$0]  %s1638_s20, 256, %s2750_s19, [#allocation6], %s2218_s4, %s2218_s4, %s2214_s17  }
0x107f   :  { %2197 = dma.done.wait [#allocation6], 256  }
0x1080   :  { %2198 = vsyncadd [#allocation6], 4294967040 }
0x1081   :  { %1647 = vsyncpa [#allocation5], 1 }
0x1082   :  { %1648 = vsyncpa [#allocation8], 1 }
0x1083   :  { %1649 = vsyncpa [#allocation11], 1 }
0x1084   :  { %1650 = vsyncpa [#allocation14], 1 }
0x1085   :  { %1651 = vsyncpa [#allocation17], 1 }
0x1086   :  { %1652 = vsyncpa [#allocation6], 1 }

</bundles_post_ra>
